<compile_context>
chip_gen: v7x
topology: tpu7x:2x2x1
jax: 0.10.0
libtpu: 0.0.40
codegen_flags: <defaults>
</compile_context>

<pallas_src>
import functools

import jax
import jax.numpy as jnp
from jax.experimental import pallas as pl
from jax.experimental.pallas import tpu as pltpu

LEAKY_SLOPE = 0.01   # PyTorch nn.LeakyReLU default


# ---------------------------------------------------------------------------
# Small helpers
# ---------------------------------------------------------------------------
def _round_up(n, m):
    return ((n + m - 1) // m) * m


def _cdiv(a, b):
    return -(-a // b)


def _sublane(dtype):
    # rows per sublane tile: 8 for 4-byte, 16 for bf16/f16, 32 for 1-byte
    return {4: 8, 2: 16, 1: 32}.get(jnp.dtype(dtype).itemsize, 8)


def _leaky_relu(x):
    # identical to where(x>0, x, s*x) for slope in (0,1); 2 VALU ops instead of 3
    return jnp.maximum(x, LEAKY_SLOPE * x)


@functools.lru_cache(maxsize=None)
def _tpu_vmem_capacity():
    try:
        return int(pltpu.get_tpu_info().vmem_capacity_bytes)
    except Exception:
        return 128 * 1024 * 1024        # v5e/v6e assumption if query unavailable


def _vmem_limit_bytes(vmem_est):
    cap = _tpu_vmem_capacity()
    # Always set explicitly (v5e scoped default is only 16 MiB).  Leave 25% of
    # physical VMEM for compiler scratch/spill: ~48 MiB ceiling on v7x.
    return int(min(max(4 * int(vmem_est), 16 * 1024 * 1024), (3 * cap) // 4))


def _default_tile_rows(rows, sub):
    cap = _tpu_vmem_capacity()
    base = 1024 if cap > 96 * 1024 * 1024 else 512   # bigger tiles on 128-MiB parts
    tile = max(sub, min(_round_up(rows, sub), base))
    if cap <= 64 * 1024 * 1024 and rows > sub:
        # v7x-like part (64 MiB VMEM, 2 TensorCores): keep >= 2 grid steps so
        # the "parallel" axis actually spans both cores.
        tile = min(tile, max(sub, _round_up(_cdiv(rows, 2), sub)))
    return tile


_PIPELINE_MODE_SUPPORTED = None   # lazily probed; None = unknown


def _run_with_pipeline_modes(run):
    """run(use_modes: bool) -> out.  Falls back if pipeline_mode is rejected."""
    global _PIPELINE_MODE_SUPPORTED
    if _PIPELINE_MODE_SUPPORTED is not False:
        try:
            out = run(True)
            _PIPELINE_MODE_SUPPORTED = True
            return out
        except Exception:
            _PIPELINE_MODE_SUPPORTED = False
    return run(False)


def _param_spec(shape, use_modes):
    if use_modes:
        # Constant block index -> single VMEM buffer is enough (no double buffer).
        return pl.BlockSpec(shape, lambda i: (0, 0), pipeline_mode=pl.Buffered(1))
    return pl.BlockSpec(shape, lambda i: (0, 0))


# ---------------------------------------------------------------------------
# In-kernel MLP: x @ W0 + b0 -> LeakyReLU -> ...  (f32 accumulation)
# ---------------------------------------------------------------------------
def _apply_mlp(h, param_refs, num_layers, act_last):
    """param_refs = [w0, b0, w1, b1, ...] refs.  Returns f32 activations."""
    for i in range(num_layers):
        w = param_refs[2 * i][...]
        b = param_refs[2 * i + 1][...].astype(jnp.float32)
        acc = jnp.dot(h.astype(w.dtype), w,
                      preferred_element_type=jnp.float32) + b
        if i < num_layers - 1 or act_last:
            acc = _leaky_relu(acc)
        h = acc
    return h


def _l2_normalize(h):
    # == h / max(||h||, 1e-12)  (matches F.normalize(p=2));  rsqrt -> EUP slot
    sumsq = jnp.sum(h * h, axis=-1, keepdims=True)
    return h * jax.lax.rsqrt(jnp.maximum(sumsq, 1e-24))


# ---------------------------------------------------------------------------
# Standalone fused-MLP kernel (building block / fallback path)
# ---------------------------------------------------------------------------
def _mlp_kernel(*refs, num_layers, acf_f_last, l2_normalize):
    x_ref, out_ref = refs[0], refs[-1]
    h = _apply_mlp(x_ref[...], refs[1:-1], num_layers, acf_f_last)
    if l2_normalize:
        h = _l2_normalize(h)
    out_ref[...] = h.astype(out_ref.dtype)


def mlp_forward(x, weights, biases, acf_f_last=True, l2_normalize=False,
                tile_rows=None, compute_dtype=None):
    """x: [rows, in_dim]; weights[i]: [in_i, out_i]; biases[i]: [1, out_i]."""
    num_layers = len(weights)
    if compute_dtype is not None:
        x = x.astype(compute_dtype)
        weights = [w.astype(compute_dtype) for w in weights]
    biases = [b.astype(jnp.float32) for b in biases]      # bias add stays f32
    rows, in_dim = x.shape
    out_dim = weights[-1].shape[1]

    sub = _sublane(x.dtype)
    if tile_rows is None:
        tile_rows = _default_tile_rows(rows, sub)
    tile_rows = max(sub, _round_up(tile_rows, sub))
    rows_p = _round_up(rows, tile_rows)
    x_p = x if rows_p == rows else jnp.pad(x, ((0, rows_p - rows), (0, 0)))
    num_steps = rows_p // tile_rows

    itemsize = jnp.dtype(x.dtype).itemsize
    dims = [in_dim] + [w.shape[1] for w in weights]
    param_bytes = (sum(int(w.size) * jnp.dtype(w.dtype).itemsize for w in weights)
                   + sum(int(b.size) * 4 for b in biases))
    flops = 2 * rows_p * sum(a * b for a, b in zip(dims[:-1], dims[1:]))
    bytes_accessed = int(x_p.size) * itemsize + param_bytes + rows_p * out_dim * itemsize
    cost = pl.CostEstimate(flops=int(flops),
                           transcendentals=int(rows_p if l2_normalize else 0),
                           bytes_accessed=int(bytes_accessed))

    vmem_est = (param_bytes
                + 3 * tile_rows * in_dim * itemsize        # streamed act buffers
                + 2 * tile_rows * out_dim * itemsize
                + 4 * tile_rows * max(dims) * 4)           # f32 temporaries headroom
    vmem_limit = _vmem_limit_bytes(vmem_est)

    kernel = functools.partial(_mlp_kernel, num_layers=num_layers,
                               acf_f_last=acf_f_last, l2_normalize=l2_normalize)
    out_shape = jax.ShapeDtypeStruct((rows_p, out_dim), x.dtype)

    def run(use_modes):
        if use_modes and num_steps >= 4:
            # DMA for the next tile is unlikely hidden at depth 2 for this much
            # compute per tile -> deepen the activation stream pipeline.
            x_spec = pl.BlockSpec((tile_rows, in_dim), lambda i: (i, 0),
                                  pipeline_mode=pl.Buffered(3))
        else:
            x_spec = pl.BlockSpec((tile_rows, in_dim), lambda i: (i, 0))
        in_specs = [x_spec]
        in_arrays = [x_p]
        for w, b in zip(weights, biases):
            in_specs += [_param_spec(w.shape, use_modes),
                         _param_spec(b.shape, use_modes)]
            in_arrays += [w, b]
        return pl.pallas_call(
            kernel,
            out_shape=out_shape,
            grid=(num_steps,),
            in_specs=in_specs,
            out_specs=pl.BlockSpec((tile_rows, out_dim), lambda i: (i, 0)),
            compiler_params=pltpu.CompilerParams(
                dimension_semantics=("parallel",),
                vmem_limit_bytes=vmem_limit),
            cost_estimate=cost,
        )(*in_arrays)

    out = _run_with_pipeline_modes(run)
    return out[:rows, :]


# ---------------------------------------------------------------------------
# Fully fused head kernel:
#   img2vec_encoder MLP (per image) -> streaming pooling -> encoder MLP
#   -> projection MLP -> L2 norm, in a single pallas_call
# ---------------------------------------------------------------------------
def _head_kernel(*refs, n_images, methods, layer_counts, act_last, l2_normalize):
    x_ref, out_ref = refs[0], refs[-1]
    params = refs[1:-1]
    n_ie, n_en, n_pr = layer_counts
    ie = params[:2 * n_ie]
    en = params[2 * n_ie:2 * (n_ie + n_en)]
    pr = params[2 * (n_ie + n_en):]

    # Per-image img2vec_encoder + streaming pooling accumulators: avoids both
    # the (B, n, D) reshape and the sublane-axis reduction entirely.
    acc_max = acc_min = acc_sum = None
    for im in range(n_images):
        hi = _apply_mlp(x_ref[:, im, :], ie, n_ie, act_last[0]).astype(jnp.float32)
        if 'max' in methods:
            acc_max = hi if acc_max is None else jnp.maximum(acc_max, hi)
        if 'min' in methods:
            acc_min = hi if acc_min is None else jnp.minimum(acc_min, hi)
        if 'mean' in methods:
            acc_sum = hi if acc_sum is None else acc_sum + hi

    parts = []
    for m in methods:
        if m == 'max':
            parts.append(acc_max)
        elif m == 'min':
            parts.append(acc_min)
        elif m == 'mean':
            parts.append(acc_sum * (1.0 / n_images))
    h = parts[0] if len(parts) == 1 else jnp.concatenate(parts, axis=-1)

    h = _apply_mlp(h, en, n_en, act_last[1])        # encoder MLP
    h = _apply_mlp(h, pr, n_pr, act_last[2])        # projection MLP
    if l2_normalize:
        h = _l2_normalize(h)
    out_ref[...] = h.astype(out_ref.dtype)


def triplet_head_forward(x, params, *, pooling='max', l2_norm=True,
                         act_f_last_encoder=True, act_f_last_projection=True,
                         tile_rows=None, compute_dtype=None):
    """x: [bsz, n_images, emb] image-embedding vectors. One fused kernel."""
    bsz, n_images, emb = x.shape
    methods = tuple(pooling.split('-'))

    def get(name):
        p = params.get(name)
        if not p:
            return [], []
        return list(p['w']), list(p['b'])

    w_ie, b_ie = get('img2vec_encoder')
    w_en, b_en = get('encoder')
    w_pr, b_pr = get('projection')

    if compute_dtype is not None:
        x = x.astype(compute_dtype)
        w_ie = [w.astype(compute_dtype) for w in w_ie]
        w_en = [w.astype(compute_dtype) for w in w_en]
        w_pr = [w.astype(compute_dtype) for w in w_pr]
    b_ie = [b.astype(jnp.float32) for b in b_ie]
    b_en = [b.astype(jnp.float32) for b in b_en]
    b_pr = [b.astype(jnp.float32) for b in b_pr]

    vec = w_ie[-1].shape[1] if w_ie else emb
    pooled_dim = vec * len(methods)
    enc_out = w_en[-1].shape[1] if w_en else pooled_dim
    out_dim = w_pr[-1].shape[1] if w_pr else enc_out

    sub = _sublane(x.dtype)
    if tile_rows is None:
        tile_rows = _default_tile_rows(bsz, sub)
    tile_rows = max(sub, _round_up(tile_rows, sub))
    rows_p = _round_up(bsz, tile_rows)
    x_p = x if rows_p == bsz else jnp.pad(x, ((0, rows_p - bsz), (0, 0), (0, 0)))
    num_steps = rows_p // tile_rows

    param_arrays = []
    for w_list, b_list in ((w_ie, b_ie), (w_en, b_en), (w_pr, b_pr)):
        for w, b in zip(w_list, b_list):
            param_arrays += [w, b]

    itemsize = jnp.dtype(x.dtype).itemsize
    param_bytes = sum(int(p.size) * jnp.dtype(p.dtype).itemsize for p in param_arrays)
    dims_ie = [emb] + [w.shape[1] for w in w_ie]
    dims_tail = [pooled_dim] + [w.shape[1] for w in w_en] + [w.shape[1] for w in w_pr]
    flops = (2 * rows_p * n_images * sum(a * b for a, b in zip(dims_ie[:-1], dims_ie[1:]))
             + 2 * rows_p * sum(a * b for a, b in zip(dims_tail[:-1], dims_tail[1:])))
    bytes_accessed = int(x_p.size) * itemsize + param_bytes + rows_p * out_dim * itemsize
    cost = pl.CostEstimate(flops=int(flops),
                           transcendentals=int(rows_p if l2_norm else 0),
                           bytes_accessed=int(bytes_accessed))

    max_dim = max(dims_ie + dims_tail + [out_dim])
    vmem_est = (param_bytes
                + 2 * tile_rows * n_images * emb * itemsize
                + 2 * tile_rows * out_dim * itemsize
                + 6 * tile_rows * max_dim * 4)
    vmem_limit = _vmem_limit_bytes(vmem_est)

    kernel = functools.partial(
        _head_kernel, n_images=n_images, methods=methods,
        layer_counts=(len(w_ie), len(w_en), len(w_pr)),
        act_last=(act_f_last_encoder, act_f_last_encoder, act_f_last_projection),
        l2_normalize=bool(l2_norm))
    out_shape = jax.ShapeDtypeStruct((rows_p, out_dim), x.dtype)

    def run(use_modes):
        in_specs = [pl.BlockSpec((tile_rows, n_images, emb), lambda i: (i, 0, 0))]
        in_specs += [_param_spec(p.shape, use_modes) for p in param_arrays]
        return pl.pallas_call(
            kernel,
            out_shape=out_shape,
            grid=(num_steps,),
            in_specs=in_specs,
            out_specs=pl.BlockSpec((tile_rows, out_dim), lambda i: (i, 0)),
            compiler_params=pltpu.CompilerParams(
                dimension_semantics=("parallel",),
                vmem_limit_bytes=vmem_limit),
            cost_estimate=cost,
        )(x_p, *param_arrays)

    out = _run_with_pipeline_modes(run)
    return out[:bsz, :]


# ---------------------------------------------------------------------------
# TripletPlaceEmbedding forward (post-backbone), train=True path
# ---------------------------------------------------------------------------
def triplet_place_embedding_forward(x1, x2, x3, params, *, pooling='max',
                                    l2_norm=True, act_f_last_encoder=True,
                                    act_f_last_projection=True,
                                    compute_dtype=None):
    """x1/x2/x3: [B, n_images, imgemb_size] image-embedding vectors."""
    tr_batch = x1.shape[0]
    x = jnp.concatenate([x1, x2, x3], axis=0)               # [3B, n_images, E]
    methods = pooling.split('-')
    fused_ok = pooling != 'concat' and all(m in ('max', 'min', 'mean') for m in methods)

    if fused_ok:
        # Single fused pallas_call for the whole post-backbone head.
        h = triplet_head_forward(
            x, params, pooling=pooling, l2_norm=l2_norm,
            act_f_last_encoder=act_f_last_encoder,
            act_f_last_projection=act_f_last_projection,
            compute_dtype=compute_dtype)
    else:
        # Fallback (std / concat pooling): separate MLP kernels + JAX pooling.
        bsz, n_images, emb = x.shape
        h = x.reshape(bsz * n_images, emb)
        if params.get('img2vec_encoder'):
            h = mlp_forward(h, params['img2vec_encoder']['w'],
                            params['img2vec_encoder']['b'],
                            acf_f_last=act_f_last_encoder,
                            compute_dtype=compute_dtype)
        h = h.reshape(bsz, n_images, -1)
        if pooling == 'concat':
            pooled = h.reshape(bsz, -1)
        else:
            parts = []
            for m in methods:
                if m == 'max':
                    parts.append(h.max(axis=1))
                elif m == 'min':
                    parts.append(h.min(axis=1))
                elif m == 'mean':
                    parts.append(h.mean(axis=1))
                elif m == 'std':
                    parts.append(h.std(axis=1, ddof=1))     # torch.std is unbiased
                else:
                    # TODO(synk): 'median' pooling (torch lower-median) not implemented.
                    raise NotImplementedError(f"pooling '{m}' not implemented")
            pooled = jnp.concatenate(parts, axis=1)
        h = pooled
        if params.get('encoder'):
            h = mlp_forward(h, params['encoder']['w'], params['encoder']['b'],
                            acf_f_last=act_f_last_encoder, compute_dtype=compute_dtype)
        if params.get('projection'):
            h = mlp_forward(h, params['projection']['w'], params['projection']['b'],
                            acf_f_last=act_f_last_projection,
                            l2_normalize=l2_norm, compute_dtype=compute_dtype)
        elif l2_norm:
            nrm = jnp.sqrt(jnp.sum(h * h, axis=-1, keepdims=True))
            h = h / jnp.maximum(nrm, 1e-12)

    return h[:tr_batch], h[tr_batch:2 * tr_batch], h[2 * tr_batch:]


# ---------------------------------------------------------------------------
# Pure-JAX references + PyTorch-style init
# ---------------------------------------------------------------------------
def mlp_reference(x, weights, biases, acf_f_last=True):
    h = x
    n = len(weights)
    for i, (w, b) in enumerate(zip(weights, biases)):
        h = jnp.dot(h, w, precision=jax.lax.Precision.HIGHEST) + b
        if i < n - 1 or acf_f_last:
            h = _leaky_relu(h)
    return h


def triplet_reference(x1, x2, x3, params, pooling='max', l2_norm=True):
    tr = x1.shape[0]
    x = jnp.concatenate([x1, x2, x3], axis=0)
    bsz, n_images, emb = x.shape
    h = mlp_reference(x.reshape(bsz * n_images, emb),
                      params['img2vec_encoder']['w'], params['img2vec_encoder']['b'])
    h = h.reshape(bsz, n_images, -1)
    assert pooling == 'max'
    pooled = h.max(axis=1)
    h = mlp_reference(pooled, params['encoder']['w'], params['encoder']['b'])
    h = mlp_reference(h, params['projection']['w'], params['projection']['b'])
    if l2_norm:
        nrm = jnp.sqrt(jnp.sum(h * h, axis=1, keepdims=True))
        h = h / jnp.maximum(nrm, 1e-12)
    return h[:tr], h[tr:2 * tr], h[2 * tr:]


def init_mlp_params(key, input_size, layer_sizes, dtype=jnp.float32):
    """PyTorch nn.Linear default init: U(-1/sqrt(fan_in), 1/sqrt(fan_in))."""
    weights, biases = [], []
    fan_in = input_size
    for out_dim in layer_sizes:
        key, kw, kb = jax.random.split(key, 3)
        bound = 1.0 / float(fan_in) ** 0.5
        weights.append(jax.random.uniform(kw, (fan_in, out_dim), dtype=dtype,
                                          minval=-bound, maxval=bound))
        biases.append(jax.random.uniform(kb, (1, out_dim), dtype=dtype,
                                         minval=-bound, maxval=bound))
        fan_in = out_dim
    return weights, biases


if __name__ == "__main__":
    key = jax.random.PRNGKey(0)

    # Small shapes consistent with the module (scaled-down resnet18 sizes)
    tr_batch = 2
    n_images = 5
    imgemb_size = 64                    # stands in for the 512-d resnet18 embedding
    img2vec_encoder_layers = (64,)
    encoder_layers = (64,)
    projection_layers = (32,)
    pooling = 'max'
    l2_norm = True

    key, k1, k2, k3, kp1, kp2, kp3 = jax.random.split(key, 7)
    x1 = jax.random.normal(k1, (tr_batch, n_images, imgemb_size), jnp.float32)
    x2 = jax.random.normal(k2, (tr_batch, n_images, imgemb_size), jnp.float32)
    x3 = jax.random.normal(k3, (tr_batch, n_images, imgemb_size), jnp.float32)

    w_ie, b_ie = init_mlp_params(kp1, imgemb_size, img2vec_encoder_layers)
    pooled_size = img2vec_encoder_layers[-1]              # pooling='max' -> one method
    w_en, b_en = init_mlp_params(kp2, pooled_size, encoder_layers)
    w_pr, b_pr = init_mlp_params(kp3, encoder_layers[-1], projection_layers)
    params = {
        'img2vec_encoder': {'w': w_ie, 'b': b_ie},
        'encoder': {'w': w_en, 'b': b_en},
        'projection': {'w': w_pr, 'b': b_pr},
    }

    # --- fused head (single pallas_call), f32 ---
    o1, o2, o3 = triplet_place_embedding_forward(
        x1, x2, x3, params, pooling=pooling, l2_norm=l2_norm)
    o1, o2, o3 = jax.block_until_ready((o1, o2, o3))

    r1, r2, r3 = triplet_reference(x1, x2, x3, params, pooling=pooling, l2_norm=l2_norm)
    assert o1.shape == (tr_batch, projection_layers[-1])
    for o, r in zip((o1, o2, o3), (r1, r2, r3)):
        assert jnp.allclose(o, r, atol=1e-4, rtol=1e-4), "mismatch vs reference (f32)"

    # --- bf16 MXU-operand path (f32 accumulation), loose tolerance ---
    b1, b2, b3 = triplet_place_embedding_forward(
        x1, x2, x3, params, pooling=pooling, l2_norm=l2_norm,
        compute_dtype=jnp.bfloat16)
    b1, b2, b3 = jax.block_until_ready((b1, b2, b3))
    for o, r in zip((b1, b2, b3), (r1, r2, r3)):
        assert jnp.allclose(o.astype(jnp.float32), r, atol=5e-2, rtol=5e-2), \
            "mismatch vs reference (bf16)"

    # --- standalone MLP kernel: multi-tile grid (exercises Buffered(3) stream) ---
    key, kx, kp = jax.random.split(key, 3)
    xb = jax.random.normal(kx, (1024, 256), jnp.float32)
    wb, bb = init_mlp_params(kp, 256, (256, 128))
    ob = jax.block_until_ready(mlp_forward(xb, wb, bb, acf_f_last=True, tile_rows=256))
    rb = mlp_reference(xb, wb, bb, acf_f_last=True)
    assert jnp.allclose(ob, rb, atol=1e-3, rtol=1e-3), "mismatch vs reference (big)"

    # --- standalone MLP kernel: unaligned feature dims (no padding path) ---
    key, kx2, kp2b = jax.random.split(key, 3)
    xs = jax.random.normal(kx2, (100, 200), jnp.float32)
    ws, bs = init_mlp_params(kp2b, 200, (96, 48))
    os_ = jax.block_until_ready(mlp_forward(xs, ws, bs, acf_f_last=True))
    rs = mlp_reference(xs, ws, bs, acf_f_last=True)
    assert jnp.allclose(os_, rs, atol=1e-3, rtol=1e-3), "mismatch vs reference (unaligned)"

    print("KERNEL_OK")
</pallas_src>

<mosaic_0001>
module attributes {stable_mosaic.version = 11 : i64} {
  func.func @_head_kernel(%arg0: i32, %arg1: memref<8x5x64xf32, #tpu.memory_space<vmem>>, %arg2: memref<64x64xf32, #tpu.memory_space<vmem>>, %arg3: memref<1x64xf32, #tpu.memory_space<vmem>>, %arg4: memref<64x64xf32, #tpu.memory_space<vmem>>, %arg5: memref<1x64xf32, #tpu.memory_space<vmem>>, %arg6: memref<64x32xf32, #tpu.memory_space<vmem>>, %arg7: memref<1x32xf32, #tpu.memory_space<vmem>>, %arg8: memref<8x32xf32, #tpu.memory_space<vmem>>) attributes {dimension_semantics = [#tpu.dimension_semantics<parallel>], iteration_bounds = array<i64: 1>, scalar_prefetch = 0 : i64, scratch_operands = 0 : i64, tpu.core_type = #tpu.core_type<tc>, window_params = [{transform_indices = @transform_0, window_bounds = array<i64: 8, 5, 64>}, {pipeline_mode = #tpu.pipeline_mode<synchronous>, transform_indices = @transform_1, window_bounds = array<i64: 64, 64>}, {pipeline_mode = #tpu.pipeline_mode<synchronous>, transform_indices = @transform_2, window_bounds = array<i64: 1, 64>}, {pipeline_mode = #tpu.pipeline_mode<synchronous>, transform_indices = @transform_3, window_bounds = array<i64: 64, 64>}, {pipeline_mode = #tpu.pipeline_mode<synchronous>, transform_indices = @transform_4, window_bounds = array<i64: 1, 64>}, {pipeline_mode = #tpu.pipeline_mode<synchronous>, transform_indices = @transform_5, window_bounds = array<i64: 64, 32>}, {pipeline_mode = #tpu.pipeline_mode<synchronous>, transform_indices = @transform_6, window_bounds = array<i64: 1, 32>}, {transform_indices = @transform_7, window_bounds = array<i64: 8, 32>}]} {
    %c0 = arith.constant 0 : index
    %c0_0 = arith.constant 0 : index
    %c0_1 = arith.constant 0 : index
    %0 = vector.load %arg1[%c0, %c0_0, %c0_1] : memref<8x5x64xf32, #tpu.memory_space<vmem>>, vector<8x1x64xf32>
    %1 = vector.shape_cast %0 : vector<8x1x64xf32> to vector<8x64xf32>
    %c0_2 = arith.constant 0 : index
    %c0_3 = arith.constant 0 : index
    %2 = vector.load %arg2[%c0_2, %c0_3] : memref<64x64xf32, #tpu.memory_space<vmem>>, vector<64x64xf32>
    %c0_4 = arith.constant 0 : index
    %c0_5 = arith.constant 0 : index
    %3 = vector.load %arg3[%c0_4, %c0_5] : memref<1x64xf32, #tpu.memory_space<vmem>>, vector<1x64xf32>
    %cst = arith.constant dense<0.000000e+00> : vector<8x64xf32>
    %4 = tpu.matmul %1, %2, %cst {dimension_numbers = #tpu.dot_dimension_numbers<[1], [0], [0], [1], [0, 0, 1, 1], [], []>} : vector<8x64xf32>, vector<64x64xf32>, vector<8x64xf32> -> vector<8x64xf32>
    %5 = vector.broadcast %3 : vector<1x64xf32> to vector<8x64xf32>
    %6 = arith.addf %4, %5 : vector<8x64xf32>
    %cst_6 = arith.constant 0.00999999977 : f32
    %7 = vector.broadcast %cst_6 : f32 to vector<8x64xf32>
    %8 = arith.mulf %7, %6 : vector<8x64xf32>
    %9 = arith.maximumf %6, %8 : vector<8x64xf32>
    %c0_7 = arith.constant 0 : index
    %c1 = arith.constant 1 : index
    %c0_8 = arith.constant 0 : index
    %10 = vector.load %arg1[%c0_7, %c1, %c0_8] : memref<8x5x64xf32, #tpu.memory_space<vmem>>, vector<8x1x64xf32>
    %11 = vector.shape_cast %10 : vector<8x1x64xf32> to vector<8x64xf32>
    %c0_9 = arith.constant 0 : index
    %c0_10 = arith.constant 0 : index
    %12 = vector.load %arg2[%c0_9, %c0_10] : memref<64x64xf32, #tpu.memory_space<vmem>>, vector<64x64xf32>
    %c0_11 = arith.constant 0 : index
    %c0_12 = arith.constant 0 : index
    %13 = vector.load %arg3[%c0_11, %c0_12] : memref<1x64xf32, #tpu.memory_space<vmem>>, vector<1x64xf32>
    %cst_13 = arith.constant dense<0.000000e+00> : vector<8x64xf32>
    %14 = tpu.matmul %11, %12, %cst_13 {dimension_numbers = #tpu.dot_dimension_numbers<[1], [0], [0], [1], [0, 0, 1, 1], [], []>} : vector<8x64xf32>, vector<64x64xf32>, vector<8x64xf32> -> vector<8x64xf32>
    %15 = vector.broadcast %13 : vector<1x64xf32> to vector<8x64xf32>
    %16 = arith.addf %14, %15 : vector<8x64xf32>
    %cst_14 = arith.constant 0.00999999977 : f32
    %17 = vector.broadcast %cst_14 : f32 to vector<8x64xf32>
    %18 = arith.mulf %17, %16 : vector<8x64xf32>
    %19 = arith.maximumf %16, %18 : vector<8x64xf32>
    %20 = arith.maximumf %9, %19 : vector<8x64xf32>
    %c0_15 = arith.constant 0 : index
    %c2 = arith.constant 2 : index
    %c0_16 = arith.constant 0 : index
    %21 = vector.load %arg1[%c0_15, %c2, %c0_16] : memref<8x5x64xf32, #tpu.memory_space<vmem>>, vector<8x1x64xf32>
    %22 = vector.shape_cast %21 : vector<8x1x64xf32> to vector<8x64xf32>
    %c0_17 = arith.constant 0 : index
    %c0_18 = arith.constant 0 : index
    %23 = vector.load %arg2[%c0_17, %c0_18] : memref<64x64xf32, #tpu.memory_space<vmem>>, vector<64x64xf32>
    %c0_19 = arith.constant 0 : index
    %c0_20 = arith.constant 0 : index
    %24 = vector.load %arg3[%c0_19, %c0_20] : memref<1x64xf32, #tpu.memory_space<vmem>>, vector<1x64xf32>
    %cst_21 = arith.constant dense<0.000000e+00> : vector<8x64xf32>
    %25 = tpu.matmul %22, %23, %cst_21 {dimension_numbers = #tpu.dot_dimension_numbers<[1], [0], [0], [1], [0, 0, 1, 1], [], []>} : vector<8x64xf32>, vector<64x64xf32>, vector<8x64xf32> -> vector<8x64xf32>
    %26 = vector.broadcast %24 : vector<1x64xf32> to vector<8x64xf32>
    %27 = arith.addf %25, %26 : vector<8x64xf32>
    %cst_22 = arith.constant 0.00999999977 : f32
    %28 = vector.broadcast %cst_22 : f32 to vector<8x64xf32>
    %29 = arith.mulf %28, %27 : vector<8x64xf32>
    %30 = arith.maximumf %27, %29 : vector<8x64xf32>
    %31 = arith.maximumf %20, %30 : vector<8x64xf32>
    %c0_23 = arith.constant 0 : index
    %c3 = arith.constant 3 : index
    %c0_24 = arith.constant 0 : index
    %32 = vector.load %arg1[%c0_23, %c3, %c0_24] : memref<8x5x64xf32, #tpu.memory_space<vmem>>, vector<8x1x64xf32>
    %33 = vector.shape_cast %32 : vector<8x1x64xf32> to vector<8x64xf32>
    %c0_25 = arith.constant 0 : index
    %c0_26 = arith.constant 0 : index
    %34 = vector.load %arg2[%c0_25, %c0_26] : memref<64x64xf32, #tpu.memory_space<vmem>>, vector<64x64xf32>
    %c0_27 = arith.constant 0 : index
    %c0_28 = arith.constant 0 : index
    %35 = vector.load %arg3[%c0_27, %c0_28] : memref<1x64xf32, #tpu.memory_space<vmem>>, vector<1x64xf32>
    %cst_29 = arith.constant dense<0.000000e+00> : vector<8x64xf32>
    %36 = tpu.matmul %33, %34, %cst_29 {dimension_numbers = #tpu.dot_dimension_numbers<[1], [0], [0], [1], [0, 0, 1, 1], [], []>} : vector<8x64xf32>, vector<64x64xf32>, vector<8x64xf32> -> vector<8x64xf32>
    %37 = vector.broadcast %35 : vector<1x64xf32> to vector<8x64xf32>
    %38 = arith.addf %36, %37 : vector<8x64xf32>
    %cst_30 = arith.constant 0.00999999977 : f32
    %39 = vector.broadcast %cst_30 : f32 to vector<8x64xf32>
    %40 = arith.mulf %39, %38 : vector<8x64xf32>
    %41 = arith.maximumf %38, %40 : vector<8x64xf32>
    %42 = arith.maximumf %31, %41 : vector<8x64xf32>
    %c0_31 = arith.constant 0 : index
    %c4 = arith.constant 4 : index
    %c0_32 = arith.constant 0 : index
    %43 = vector.load %arg1[%c0_31, %c4, %c0_32] : memref<8x5x64xf32, #tpu.memory_space<vmem>>, vector<8x1x64xf32>
    %44 = vector.shape_cast %43 : vector<8x1x64xf32> to vector<8x64xf32>
    %c0_33 = arith.constant 0 : index
    %c0_34 = arith.constant 0 : index
    %45 = vector.load %arg2[%c0_33, %c0_34] : memref<64x64xf32, #tpu.memory_space<vmem>>, vector<64x64xf32>
    %c0_35 = arith.constant 0 : index
    %c0_36 = arith.constant 0 : index
    %46 = vector.load %arg3[%c0_35, %c0_36] : memref<1x64xf32, #tpu.memory_space<vmem>>, vector<1x64xf32>
    %cst_37 = arith.constant dense<0.000000e+00> : vector<8x64xf32>
    %47 = tpu.matmul %44, %45, %cst_37 {dimension_numbers = #tpu.dot_dimension_numbers<[1], [0], [0], [1], [0, 0, 1, 1], [], []>} : vector<8x64xf32>, vector<64x64xf32>, vector<8x64xf32> -> vector<8x64xf32>
    %48 = vector.broadcast %46 : vector<1x64xf32> to vector<8x64xf32>
    %49 = arith.addf %47, %48 : vector<8x64xf32>
    %cst_38 = arith.constant 0.00999999977 : f32
    %50 = vector.broadcast %cst_38 : f32 to vector<8x64xf32>
    %51 = arith.mulf %50, %49 : vector<8x64xf32>
    %52 = arith.maximumf %49, %51 : vector<8x64xf32>
    %53 = arith.maximumf %42, %52 : vector<8x64xf32>
    %c0_39 = arith.constant 0 : index
    %c0_40 = arith.constant 0 : index
    %54 = vector.load %arg4[%c0_39, %c0_40] : memref<64x64xf32, #tpu.memory_space<vmem>>, vector<64x64xf32>
    %c0_41 = arith.constant 0 : index
    %c0_42 = arith.constant 0 : index
    %55 = vector.load %arg5[%c0_41, %c0_42] : memref<1x64xf32, #tpu.memory_space<vmem>>, vector<1x64xf32>
    %cst_43 = arith.constant dense<0.000000e+00> : vector<8x64xf32>
    %56 = tpu.matmul %53, %54, %cst_43 {dimension_numbers = #tpu.dot_dimension_numbers<[1], [0], [0], [1], [0, 0, 1, 1], [], []>} : vector<8x64xf32>, vector<64x64xf32>, vector<8x64xf32> -> vector<8x64xf32>
    %57 = vector.broadcast %55 : vector<1x64xf32> to vector<8x64xf32>
    %58 = arith.addf %56, %57 : vector<8x64xf32>
    %cst_44 = arith.constant 0.00999999977 : f32
    %59 = vector.broadcast %cst_44 : f32 to vector<8x64xf32>
    %60 = arith.mulf %59, %58 : vector<8x64xf32>
    %61 = arith.maximumf %58, %60 : vector<8x64xf32>
    %c0_45 = arith.constant 0 : index
    %c0_46 = arith.constant 0 : index
    %62 = vector.load %arg6[%c0_45, %c0_46] : memref<64x32xf32, #tpu.memory_space<vmem>>, vector<64x32xf32>
    %c0_47 = arith.constant 0 : index
    %c0_48 = arith.constant 0 : index
    %63 = vector.load %arg7[%c0_47, %c0_48] : memref<1x32xf32, #tpu.memory_space<vmem>>, vector<1x32xf32>
    %cst_49 = arith.constant dense<0.000000e+00> : vector<8x32xf32>
    %64 = tpu.matmul %61, %62, %cst_49 {dimension_numbers = #tpu.dot_dimension_numbers<[1], [0], [0], [1], [0, 0, 1, 1], [], []>} : vector<8x64xf32>, vector<64x32xf32>, vector<8x32xf32> -> vector<8x32xf32>
    %65 = vector.broadcast %63 : vector<1x32xf32> to vector<8x32xf32>
    %66 = arith.addf %64, %65 : vector<8x32xf32>
    %cst_50 = arith.constant 0.00999999977 : f32
    %67 = vector.broadcast %cst_50 : f32 to vector<8x32xf32>
    %68 = arith.mulf %67, %66 : vector<8x32xf32>
    %69 = arith.maximumf %66, %68 : vector<8x32xf32>
    %70 = arith.mulf %69, %69 : vector<8x32xf32>
    %cst_51 = arith.constant dense<0.000000e+00> : vector<8xf32>
    %71 = vector.multi_reduction <add>, %70, %cst_51 [1] : vector<8x32xf32> to vector<8xf32>
    %72 = vector.shape_cast %71 : vector<8xf32> to vector<8x1xf32>
    %cst_52 = arith.constant 1.000000e-24 : f32
    %73 = vector.broadcast %cst_52 : f32 to vector<8x1xf32>
    %74 = arith.maximumf %72, %73 : vector<8x1xf32>
    %75 = math.rsqrt %74 : vector<8x1xf32>
    %76 = vector.broadcast %75 : vector<8x1xf32> to vector<8x32xf32>
    %77 = arith.mulf %69, %76 : vector<8x32xf32>
    %c0_53 = arith.constant 0 : index
    %c0_54 = arith.constant 0 : index
    %78 = vector.load %arg8[%c0_53, %c0_54] : memref<8x32xf32, #tpu.memory_space<vmem>>, vector<8x32xf32>
    tpu.vector_store %arg8[%c0_53, %c0_54], %77 {strides = array<i32>} : memref<8x32xf32, #tpu.memory_space<vmem>>, vector<8x32xf32>,
    return
  }
  func.func @transform_0(%arg0: i32) -> (i32, i32, i32) {
    %c0_i32 = arith.constant 0 : i32
    %c0_i32_0 = arith.constant 0 : i32
    %c0_i32_1 = arith.constant 0 : i32
    return %arg0, %c0_i32, %c0_i32_0 : i32, i32, i32
  }
  func.func @transform_1(%arg0: i32) -> (i32, i32) {
    %c0_i32 = arith.constant 0 : i32
    %c0_i32_0 = arith.constant 0 : i32
    %c0_i32_1 = arith.constant 0 : i32
    return %c0_i32, %c0_i32_0 : i32, i32
  }
  func.func @transform_2(%arg0: i32) -> (i32, i32) {
    %c0_i32 = arith.constant 0 : i32
    %c0_i32_0 = arith.constant 0 : i32
    %c0_i32_1 = arith.constant 0 : i32
    return %c0_i32, %c0_i32_0 : i32, i32
  }
  func.func @transform_3(%arg0: i32) -> (i32, i32) {
    %c0_i32 = arith.constant 0 : i32
    %c0_i32_0 = arith.constant 0 : i32
    %c0_i32_1 = arith.constant 0 : i32
    return %c0_i32, %c0_i32_0 : i32, i32
  }
  func.func @transform_4(%arg0: i32) -> (i32, i32) {
    %c0_i32 = arith.constant 0 : i32
    %c0_i32_0 = arith.constant 0 : i32
    %c0_i32_1 = arith.constant 0 : i32
    return %c0_i32, %c0_i32_0 : i32, i32
  }
  func.func @transform_5(%arg0: i32) -> (i32, i32) {
    %c0_i32 = arith.constant 0 : i32
    %c0_i32_0 = arith.constant 0 : i32
    %c0_i32_1 = arith.constant 0 : i32
    return %c0_i32, %c0_i32_0 : i32, i32
  }
  func.func @transform_6(%arg0: i32) -> (i32, i32) {
    %c0_i32 = arith.constant 0 : i32
    %c0_i32_0 = arith.constant 0 : i32
    %c0_i32_1 = arith.constant 0 : i32
    return %c0_i32, %c0_i32_0 : i32, i32
  }
  func.func @transform_7(%arg0: i32) -> (i32, i32) {
    %c0_i32 = arith.constant 0 : i32
    %c0_i32_0 = arith.constant 0 : i32
    return %arg0, %c0_i32 : i32, i32
  }
}

module attributes {stable_mosaic.version = 11 : i64} {
  func.func @_head_kernel(%arg0: i32, %arg1: memref<8x5x64xf32, #tpu.memory_space<vmem>>, %arg2: memref<64x64xf32, #tpu.memory_space<vmem>>, %arg3: memref<1x64xf32, #tpu.memory_space<vmem>>, %arg4: memref<64x64xf32, #tpu.memory_space<vmem>>, %arg5: memref<1x64xf32, #tpu.memory_space<vmem>>, %arg6: memref<64x32xf32, #tpu.memory_space<vmem>>, %arg7: memref<1x32xf32, #tpu.memory_space<vmem>>, %arg8: memref<8x32xf32, #tpu.memory_space<vmem>>) attributes {dimension_semantics = [#tpu.dimension_semantics<parallel>], iteration_bounds = array<i64: 1>, scalar_prefetch = 0 : i64, scratch_operands = 0 : i64, tpu.core_type = #tpu.core_type<tc>, window_params = [{transform_indices = @transform_0, window_bounds = array<i64: 8, 5, 64>}, {pipeline_mode = #tpu.pipeline_mode<synchronous>, transform_indices = @transform_1, window_bounds = array<i64: 64, 64>}, {pipeline_mode = #tpu.pipeline_mode<synchronous>, transform_indices = @transform_2, window_bounds = array<i64: 1, 64>}, {pipeline_mode = #tpu.pipeline_mode<synchronous>, transform_indices = @transform_3, window_bounds = array<i64: 64, 64>}, {pipeline_mode = #tpu.pipeline_mode<synchronous>, transform_indices = @transform_4, window_bounds = array<i64: 1, 64>}, {pipeline_mode = #tpu.pipeline_mode<synchronous>, transform_indices = @transform_5, window_bounds = array<i64: 64, 32>}, {pipeline_mode = #tpu.pipeline_mode<synchronous>, transform_indices = @transform_6, window_bounds = array<i64: 1, 32>}, {transform_indices = @transform_7, window_bounds = array<i64: 8, 32>}]} {
    %c0 = arith.constant 0 : index
    %c0_0 = arith.constant 0 : index
    %c0_1 = arith.constant 0 : index
    %0 = vector.load %arg1[%c0, %c0_0, %c0_1] : memref<8x5x64xf32, #tpu.memory_space<vmem>>, vector<8x1x64xf32>
    %1 = vector.shape_cast %0 : vector<8x1x64xf32> to vector<8x64xf32>
    %c0_2 = arith.constant 0 : index
    %c0_3 = arith.constant 0 : index
    %2 = vector.load %arg2[%c0_2, %c0_3] : memref<64x64xf32, #tpu.memory_space<vmem>>, vector<64x64xf32>
    %c0_4 = arith.constant 0 : index
    %c0_5 = arith.constant 0 : index
    %3 = vector.load %arg3[%c0_4, %c0_5] : memref<1x64xf32, #tpu.memory_space<vmem>>, vector<1x64xf32>
    %cst = arith.constant dense<0.000000e+00> : vector<8x64xf32>
    %4 = tpu.matmul %1, %2, %cst {dimension_numbers = #tpu.dot_dimension_numbers<[1], [0], [0], [1], [0, 0, 1, 1], [], []>} : vector<8x64xf32>, vector<64x64xf32>, vector<8x64xf32> -> vector<8x64xf32>
    %5 = vector.broadcast %3 : vector<1x64xf32> to vector<8x64xf32>
    %6 = arith.addf %4, %5 : vector<8x64xf32>
    %cst_6 = arith.constant 0.00999999977 : f32
    %7 = vector.broadcast %cst_6 : f32 to vector<8x64xf32>
    %8 = arith.mulf %7, %6 : vector<8x64xf32>
    %9 = arith.maximumf %6, %8 : vector<8x64xf32>
    %c0_7 = arith.constant 0 : index
    %c1 = arith.constant 1 : index
    %c0_8 = arith.constant 0 : index
    %10 = vector.load %arg1[%c0_7, %c1, %c0_8] : memref<8x5x64xf32, #tpu.memory_space<vmem>>, vector<8x1x64xf32>
    %11 = vector.shape_cast %10 : vector<8x1x64xf32> to vector<8x64xf32>
    %c0_9 = arith.constant 0 : index
    %c0_10 = arith.constant 0 : index
    %12 = vector.load %arg2[%c0_9, %c0_10] : memref<64x64xf32, #tpu.memory_space<vmem>>, vector<64x64xf32>
    %c0_11 = arith.constant 0 : index
    %c0_12 = arith.constant 0 : index
    %13 = vector.load %arg3[%c0_11, %c0_12] : memref<1x64xf32, #tpu.memory_space<vmem>>, vector<1x64xf32>
    %cst_13 = arith.constant dense<0.000000e+00> : vector<8x64xf32>
    %14 = tpu.matmul %11, %12, %cst_13 {dimension_numbers = #tpu.dot_dimension_numbers<[1], [0], [0], [1], [0, 0, 1, 1], [], []>} : vector<8x64xf32>, vector<64x64xf32>, vector<8x64xf32> -> vector<8x64xf32>
    %15 = vector.broadcast %13 : vector<1x64xf32> to vector<8x64xf32>
    %16 = arith.addf %14, %15 : vector<8x64xf32>
    %cst_14 = arith.constant 0.00999999977 : f32
    %17 = vector.broadcast %cst_14 : f32 to vector<8x64xf32>
    %18 = arith.mulf %17, %16 : vector<8x64xf32>
    %19 = arith.maximumf %16, %18 : vector<8x64xf32>
    %20 = arith.maximumf %9, %19 : vector<8x64xf32>
    %c0_15 = arith.constant 0 : index
    %c2 = arith.constant 2 : index
    %c0_16 = arith.constant 0 : index
    %21 = vector.load %arg1[%c0_15, %c2, %c0_16] : memref<8x5x64xf32, #tpu.memory_space<vmem>>, vector<8x1x64xf32>
    %22 = vector.shape_cast %21 : vector<8x1x64xf32> to vector<8x64xf32>
    %c0_17 = arith.constant 0 : index
    %c0_18 = arith.constant 0 : index
    %23 = vector.load %arg2[%c0_17, %c0_18] : memref<64x64xf32, #tpu.memory_space<vmem>>, vector<64x64xf32>
    %c0_19 = arith.constant 0 : index
    %c0_20 = arith.constant 0 : index
    %24 = vector.load %arg3[%c0_19, %c0_20] : memref<1x64xf32, #tpu.memory_space<vmem>>, vector<1x64xf32>
    %cst_21 = arith.constant dense<0.000000e+00> : vector<8x64xf32>
    %25 = tpu.matmul %22, %23, %cst_21 {dimension_numbers = #tpu.dot_dimension_numbers<[1], [0], [0], [1], [0, 0, 1, 1], [], []>} : vector<8x64xf32>, vector<64x64xf32>, vector<8x64xf32> -> vector<8x64xf32>
    %26 = vector.broadcast %24 : vector<1x64xf32> to vector<8x64xf32>
    %27 = arith.addf %25, %26 : vector<8x64xf32>
    %cst_22 = arith.constant 0.00999999977 : f32
    %28 = vector.broadcast %cst_22 : f32 to vector<8x64xf32>
    %29 = arith.mulf %28, %27 : vector<8x64xf32>
    %30 = arith.maximumf %27, %29 : vector<8x64xf32>
    %31 = arith.maximumf %20, %30 : vector<8x64xf32>
    %c0_23 = arith.constant 0 : index
    %c3 = arith.constant 3 : index
    %c0_24 = arith.constant 0 : index
    %32 = vector.load %arg1[%c0_23, %c3, %c0_24] : memref<8x5x64xf32, #tpu.memory_space<vmem>>, vector<8x1x64xf32>
    %33 = vector.shape_cast %32 : vector<8x1x64xf32> to vector<8x64xf32>
    %c0_25 = arith.constant 0 : index
    %c0_26 = arith.constant 0 : index
    %34 = vector.load %arg2[%c0_25, %c0_26] : memref<64x64xf32, #tpu.memory_space<vmem>>, vector<64x64xf32>
    %c0_27 = arith.constant 0 : index
    %c0_28 = arith.constant 0 : index
    %35 = vector.load %arg3[%c0_27, %c0_28] : memref<1x64xf32, #tpu.memory_space<vmem>>, vector<1x64xf32>
    %cst_29 = arith.constant dense<0.000000e+00> : vector<8x64xf32>
    %36 = tpu.matmul %33, %34, %cst_29 {dimension_numbers = #tpu.dot_dimension_numbers<[1], [0], [0], [1], [0, 0, 1, 1], [], []>} : vector<8x64xf32>, vector<64x64xf32>, vector<8x64xf32> -> vector<8x64xf32>
    %37 = vector.broadcast %35 : vector<1x64xf32> to vector<8x64xf32>
    %38 = arith.addf %36, %37 : vector<8x64xf32>
    %cst_30 = arith.constant 0.00999999977 : f32
    %39 = vector.broadcast %cst_30 : f32 to vector<8x64xf32>
    %40 = arith.mulf %39, %38 : vector<8x64xf32>
    %41 = arith.maximumf %38, %40 : vector<8x64xf32>
    %42 = arith.maximumf %31, %41 : vector<8x64xf32>
    %c0_31 = arith.constant 0 : index
    %c4 = arith.constant 4 : index
    %c0_32 = arith.constant 0 : index
    %43 = vector.load %arg1[%c0_31, %c4, %c0_32] : memref<8x5x64xf32, #tpu.memory_space<vmem>>, vector<8x1x64xf32>
    %44 = vector.shape_cast %43 : vector<8x1x64xf32> to vector<8x64xf32>
    %c0_33 = arith.constant 0 : index
    %c0_34 = arith.constant 0 : index
    %45 = vector.load %arg2[%c0_33, %c0_34] : memref<64x64xf32, #tpu.memory_space<vmem>>, vector<64x64xf32>
    %c0_35 = arith.constant 0 : index
    %c0_36 = arith.constant 0 : index
    %46 = vector.load %arg3[%c0_35, %c0_36] : memref<1x64xf32, #tpu.memory_space<vmem>>, vector<1x64xf32>
    %cst_37 = arith.constant dense<0.000000e+00> : vector<8x64xf32>
    %47 = tpu.matmul %44, %45, %cst_37 {dimension_numbers = #tpu.dot_dimension_numbers<[1], [0], [0], [1], [0, 0, 1, 1], [], []>} : vector<8x64xf32>, vector<64x64xf32>, vector<8x64xf32> -> vector<8x64xf32>
    %48 = vector.broadcast %46 : vector<1x64xf32> to vector<8x64xf32>
    %49 = arith.addf %47, %48 : vector<8x64xf32>
    %cst_38 = arith.constant 0.00999999977 : f32
    %50 = vector.broadcast %cst_38 : f32 to vector<8x64xf32>
    %51 = arith.mulf %50, %49 : vector<8x64xf32>
    %52 = arith.maximumf %49, %51 : vector<8x64xf32>
    %53 = arith.maximumf %42, %52 : vector<8x64xf32>
    %c0_39 = arith.constant 0 : index
    %c0_40 = arith.constant 0 : index
    %54 = vector.load %arg4[%c0_39, %c0_40] : memref<64x64xf32, #tpu.memory_space<vmem>>, vector<64x64xf32>
    %c0_41 = arith.constant 0 : index
    %c0_42 = arith.constant 0 : index
    %55 = vector.load %arg5[%c0_41, %c0_42] : memref<1x64xf32, #tpu.memory_space<vmem>>, vector<1x64xf32>
    %cst_43 = arith.constant dense<0.000000e+00> : vector<8x64xf32>
    %56 = tpu.matmul %53, %54, %cst_43 {dimension_numbers = #tpu.dot_dimension_numbers<[1], [0], [0], [1], [0, 0, 1, 1], [], []>} : vector<8x64xf32>, vector<64x64xf32>, vector<8x64xf32> -> vector<8x64xf32>
    %57 = vector.broadcast %55 : vector<1x64xf32> to vector<8x64xf32>
    %58 = arith.addf %56, %57 : vector<8x64xf32>
    %cst_44 = arith.constant 0.00999999977 : f32
    %59 = vector.broadcast %cst_44 : f32 to vector<8x64xf32>
    %60 = arith.mulf %59, %58 : vector<8x64xf32>
    %61 = arith.maximumf %58, %60 : vector<8x64xf32>
    %c0_45 = arith.constant 0 : index
    %c0_46 = arith.constant 0 : index
    %62 = vector.load %arg6[%c0_45, %c0_46] : memref<64x32xf32, #tpu.memory_space<vmem>>, vector<64x32xf32>
    %c0_47 = arith.constant 0 : index
    %c0_48 = arith.constant 0 : index
    %63 = vector.load %arg7[%c0_47, %c0_48] : memref<1x32xf32, #tpu.memory_space<vmem>>, vector<1x32xf32>
    %cst_49 = arith.constant dense<0.000000e+00> : vector<8x32xf32>
    %64 = tpu.matmul %61, %62, %cst_49 {dimension_numbers = #tpu.dot_dimension_numbers<[1], [0], [0], [1], [0, 0, 1, 1], [], []>} : vector<8x64xf32>, vector<64x32xf32>, vector<8x32xf32> -> vector<8x32xf32>
    %65 = vector.broadcast %63 : vector<1x32xf32> to vector<8x32xf32>
    %66 = arith.addf %64, %65 : vector<8x32xf32>
    %cst_50 = arith.constant 0.00999999977 : f32
    %67 = vector.broadcast %cst_50 : f32 to vector<8x32xf32>
    %68 = arith.mulf %67, %66 : vector<8x32xf32>
    %69 = arith.maximumf %66, %68 : vector<8x32xf32>
    %70 = arith.mulf %69, %69 : vector<8x32xf32>
    %cst_51 = arith.constant dense<0.000000e+00> : vector<8xf32>
    %71 = vector.multi_reduction <add>, %70, %cst_51 [1] : vector<8x32xf32> to vector<8xf32>
    %72 = vector.shape_cast %71 : vector<8xf32> to vector<8x1xf32>
    %cst_52 = arith.constant 1.000000e-24 : f32
    %73 = vector.broadcast %cst_52 : f32 to vector<8x1xf32>
    %74 = arith.maximumf %72, %73 : vector<8x1xf32>
    %75 = math.rsqrt %74 : vector<8x1xf32>
    %76 = vector.broadcast %75 : vector<8x1xf32> to vector<8x32xf32>
    %77 = arith.mulf %69, %76 : vector<8x32xf32>
    %c0_53 = arith.constant 0 : index
    %c0_54 = arith.constant 0 : index
    %78 = vector.load %arg8[%c0_53, %c0_54] : memref<8x32xf32, #tpu.memory_space<vmem>>, vector<8x32xf32>
    tpu.vector_store %arg8[%c0_53, %c0_54], %77 {strides = array<i32>} : memref<8x32xf32, #tpu.memory_space<vmem>>, vector<8x32xf32>,
    return
  }
  func.func @transform_0(%arg0: i32) -> (i32, i32, i32) {
    %c0_i32 = arith.constant 0 : i32
    %c0_i32_0 = arith.constant 0 : i32
    %c0_i32_1 = arith.constant 0 : i32
    return %arg0, %c0_i32, %c0_i32_0 : i32, i32, i32
  }
  func.func @transform_1(%arg0: i32) -> (i32, i32) {
    %c0_i32 = arith.constant 0 : i32
    %c0_i32_0 = arith.constant 0 : i32
    %c0_i32_1 = arith.constant 0 : i32
    return %c0_i32, %c0_i32_0 : i32, i32
  }
  func.func @transform_2(%arg0: i32) -> (i32, i32) {
    %c0_i32 = arith.constant 0 : i32
    %c0_i32_0 = arith.constant 0 : i32
    %c0_i32_1 = arith.constant 0 : i32
    return %c0_i32, %c0_i32_0 : i32, i32
  }
  func.func @transform_3(%arg0: i32) -> (i32, i32) {
    %c0_i32 = arith.constant 0 : i32
    %c0_i32_0 = arith.constant 0 : i32
    %c0_i32_1 = arith.constant 0 : i32
    return %c0_i32, %c0_i32_0 : i32, i32
  }
  func.func @transform_4(%arg0: i32) -> (i32, i32) {
    %c0_i32 = arith.constant 0 : i32
    %c0_i32_0 = arith.constant 0 : i32
    %c0_i32_1 = arith.constant 0 : i32
    return %c0_i32, %c0_i32_0 : i32, i32
  }
  func.func @transform_5(%arg0: i32) -> (i32, i32) {
    %c0_i32 = arith.constant 0 : i32
    %c0_i32_0 = arith.constant 0 : i32
    %c0_i32_1 = arith.constant 0 : i32
    return %c0_i32, %c0_i32_0 : i32, i32
  }
  func.func @transform_6(%arg0: i32) -> (i32, i32) {
    %c0_i32 = arith.constant 0 : i32
    %c0_i32_0 = arith.constant 0 : i32
    %c0_i32_1 = arith.constant 0 : i32
    return %c0_i32, %c0_i32_0 : i32, i32
  }
  func.func @transform_7(%arg0: i32) -> (i32, i32) {
    %c0_i32 = arith.constant 0 : i32
    %c0_i32_0 = arith.constant 0 : i32
    return %arg0, %c0_i32 : i32, i32
  }
}

</mosaic_0001>

<bundles_post_ra>
// kernel: tpu_custom_call.1
= control target key start
LH: loop header
LB: loop body
LE: loop exit
PB: predicated region body
PF: predicated region fallthrough
CT: control target
= control target key end

     0   :  { %v1097_v3 = vmov 0.0|0.0   ;;  %vm1098_vm0 = vmmov 0   ;;  %v1099_v8 = vmov 0.0   ;;  %vm59_vm1 = vcmask 1041409   ;;  %s1466_s0 = inlined_call_operand.vmem [shape: f32[8,5,64], index: 0, kind: input, shape index: {}]   ;;  %s1467_s1 = inlined_call_operand.vmem [shape: f32[64,64], index: 1, kind: input, shape index: {}]   ;;  %s1468_s2 = inlined_call_operand.vmem [shape: f32[1,64], index: 2, kind: input, shape index: {}]   ;;  %s1469_s3 = inlined_call_operand.vmem [shape: f32[64,64], index: 3, kind: input, shape index: {}]   ;;  %s1470_s4 = inlined_call_operand.vmem [shape: f32[1,64], index: 4, kind: input, shape index: {}]   ;;  %s1471_s5 = inlined_call_operand.vmem [shape: f32[64,32], index: 5, kind: input, shape index: {}]   ;;  %s1472_s6 = inlined_call_operand.vmem [shape: f32[1,32], index: 6, kind: input, shape index: {}]   ;;  %s1473_s7 = inlined_call_operand.hbm [shape: f32[8,32], index: 7, kind: output, shape index: {}]  }
   0x1   :  { %v35_v0 = vld [vmem:[%s1467_s1] sm:$0xff]  ;;  %v36_v1 = vld [vmem:[%s1467_s1 + $0x8] sm:$0xff]  ;;  %v37_v2 = vld [vmem:[%s1467_s1 + $0x10] sm:$0xff]  ;;  %983 = vmatprep.subr.bf16.mxu0 %v1097_v3  ;;  %995 = vmatprep.subr.bf16.mxu1 %v1097_v3  ;;  %vm62_vm2 = vcmask 1042434   ;;  %vm65_vm3 = vcmask 1043459   ;;  %vm68_vm4 = vcmask 1044484  }
   0x2   :  { %v1152_v4 = vpack.c.bf16 %v36_v1, %v35_v0  ;;  %v38_v5 = vld [vmem:[%s1467_s1 + $0x18] sm:$0xff]  ;;  %v39_v6 = vld [vmem:[%s1467_s1 + $0x20] sm:$0xff]  ;;  %v40_v7 = vld [vmem:[%s1467_s1 + $0x28] sm:$0xff]  ;;  %866 = vmatprep.mubr.msk.f32.mxu0 %vm1098_vm0, %v1099_v8  ;;  %885 = vmatprep.mubr.msk.f32.mxu1 %vm1098_vm0, %v1099_v8  ;;  %vm71_vm5 = vcmask 1045509   ;;  %vm74_vm6 = vcmask 1046534   ;;  %vm77_vm7 = vcmask 1047559  }
   0x3   :  { %v27_v9 = vld [vmem:[%s1466_s0] sm:$0x1]  ;;  %v1172_v10 = vpack.c.bf16 %v38_v5, %v37_v2  ;;  %v28_v11 = vld [vmem:[%s1466_s0 + $0x8] sm:$0x1]  ;;  %v29_v12 = vld [vmem:[%s1466_s0 + $0x10] sm:$0x1]  ;;  %v1205_v26 = vpack.c.bf16 %v40_v7, %v39_v6 }
   0x4   :  { %985 = vmatpush3.bf16.msra.mxu0 %v1152_v4  ;;  %997 = vmatpush3.bf16.msra.mxu1 %v1152_v4  ;;  %v30_v13 = vld [vmem:[%s1466_s0 + $0x18] sm:$0x1]  ;;  %v31_v14 = vld [vmem:[%s1466_s0 + $0x20] sm:$0x1]  ;;  %v32_v15 = vld [vmem:[%s1466_s0 + $0x28] sm:$0x1] }
   0x5   :  { %986 = vmatprep.subr.bf16.mxu0 %v1097_v3  ;;  %998 = vmatprep.subr.bf16.mxu1 %v1097_v3  ;;  %v33_v16 = vld [vmem:[%s1466_s0 + $0x30] sm:$0x1]  ;;  %v42_v18 = vld [vmem:[%s1467_s1 + $0x38] sm:$0xff]  ;;  %v58_v19 = vrot.slane %v28_v11, 7  ;;  %v61_v20 = vrot.slane %v29_v12, 6  ;;  %v64_v21 = vrot.slane %v30_v13, 5 }
   0x6   :  { %v41_v17 = vld [vmem:[%s1467_s1 + $0x30] sm:$0xff]  ;;  %v34_v22 = vld [vmem:[%s1466_s0 + $0x38] sm:$0x1]  ;;  %v67_v23 = vrot.slane %v31_v14, 4  ;;  %v70_v24 = vrot.slane %v32_v15, 3  ;;  %v73_v25 = vrot.slane %v33_v16, 2 }
   0x7   :  { %v60_v27 = vsel %vm59_vm1, %v58_v19, %v27_v9  ;;  %v154_v28 = vld [vmem:[%s1466_s0 + $0x1] sm:$0x1]  ;;  %v155_v29 = vld [vmem:[%s1466_s0 + $0x9] sm:$0x1]  ;;  %v156_v30 = vld [vmem:[%s1466_s0 + $0x11] sm:$0x1]  ;;  %v1233_v39 = vpack.c.bf16 %v42_v18, %v41_v17 }
   0x8   :  { %988 = vmatpush3.bf16.msra.mxu0 %v1172_v10  ;;  %1000 = vmatpush3.bf16.msra.mxu1 %v1172_v10  ;;  %v63_v31 = vsel %vm62_vm2, %v61_v20, %v60_v27  ;;  %v157_v32 = vld [vmem:[%s1466_s0 + $0x19] sm:$0x1]  ;;  %v158_v33 = vld [vmem:[%s1466_s0 + $0x21] sm:$0x1]  ;;  %v159_v34 = vld [vmem:[%s1466_s0 + $0x29] sm:$0x1] }
   0x9   :  { %989 = vmatprep.subr.bf16.mxu0 %v1097_v3  ;;  %1001 = vmatprep.subr.bf16.mxu1 %v1097_v3  ;;  %v66_v35 = vsel %vm65_vm3, %v64_v21, %v63_v31  ;;  %v160_v36 = vld [vmem:[%s1466_s0 + $0x31] sm:$0x1]  ;;  %v170_v37 = vrot.slane %v155_v29, 7  ;;  %v172_v38 = vrot.slane %v156_v30, 6  ;;  %v161_v41 = vld [vmem:[%s1466_s0 + $0x39] sm:$0x1] }
   0xa   :  { %v69_v40 = vsel %vm68_vm4, %v67_v23, %v66_v35  ;;  %v174_v42 = vrot.slane %v157_v32, 5  ;;  %v176_v43 = vrot.slane %v158_v33, 4  ;;  %v76_v45 = vrot.slane %v34_v22, 1  ;;  %v260_v48 = vld [vmem:[%s1466_s0 + $0xa] sm:$0x1] }
   0xb   :  { %v72_v44 = vsel %vm71_vm5, %v70_v24, %v69_v40  ;;  %v171_v46 = vsel %vm59_vm1, %v170_v37, %v154_v28  ;;  %v178_v47 = vrot.slane %v159_v34, 3  ;;  %v261_v49 = vld [vmem:[%s1466_s0 + $0x12] sm:$0x1]  ;;  %v180_v52 = vrot.slane %v160_v36, 2  ;;  %v259_v53 = vld [vmem:[%s1466_s0 + $0x2] sm:$0x1] }
   0xc   :  { %991 = vmatpush3.bf16.msra.mxu0 %v1205_v26  ;;  %1003 = vmatpush3.bf16.msra.mxu1 %v1205_v26  ;;  %v75_v50 = vsel %vm74_vm6, %v73_v25, %v72_v44  ;;  %v173_v51 = vsel %vm62_vm2, %v172_v38, %v171_v46  ;;  %v262_v54 = vld [vmem:[%s1466_s0 + $0x1a] sm:$0x1]  ;;  %v182_v56 = vrot.slane %v161_v41, 1  ;;  %v275_v57 = vrot.slane %v260_v48, 7  ;;  %v263_v60 = vld [vmem:[%s1466_s0 + $0x22] sm:$0x1] }
   0xd   :  { %992 = vmatprep.subr.bf16.mxu0 %v1097_v3  ;;  %1004 = vmatprep.subr.bf16.mxu1 %v1097_v3  ;;  %v175_v55 = vsel %vm65_vm3, %v174_v42, %v173_v51  ;;  %v277_v58 = vrot.slane %v261_v49, 6  ;;  %vm79_vm8 = vcmask 523264   ;;  %v78_v61 = vsel %vm77_vm7, %v76_v45, %v75_v50  ;;  %v365_v1 = vld [vmem:[%s1466_s0 + $0xb] sm:$0x1]  ;;  %v366_v2 = vld [vmem:[%s1466_s0 + $0x13] sm:$0x1] }
   0xe   :  { %v177_v59 = vsel %vm68_vm4, %v176_v43, %v175_v55  ;;  %v276_v63 = vsel %vm59_vm1, %v275_v57, %v259_v53  ;;  %v279_v0 = vrot.slane %v262_v54, 5  ;;  %v364_v7 = vld [vmem:[%s1466_s0 + $0x3] sm:$0x1]  ;;  %v367_v9 = vld [vmem:[%s1466_s0 + $0x1b] sm:$0x1]  ;;  %v380_v14 = vrot.slane %v365_v1, 7 }
   0xf   :  { %v179_v62 = vsel %vm71_vm5, %v178_v47, %v177_v59  ;;  %v278_v6 = vsel %vm62_vm2, %v277_v58, %v276_v63  ;;  %v368_v11 = vld [vmem:[%s1466_s0 + $0x23] sm:$0x1]  ;;  %v264_v13 = vld [vmem:[%s1466_s0 + $0x2a] sm:$0x1]  ;;  %v382_v15 = vrot.slane %v366_v2, 6  ;;  %v281_v16 = vrot.slane %v263_v60, 4 }
  0x10   :  { %994 = vmatpush3.bf16.msra.mxu0 %v1233_v39  ;;  %1006 = vmatpush3.bf16.msra.mxu1 %v1233_v39  ;;  %v181_v5 = vsel %vm74_vm6, %v180_v52, %v179_v62  ;;  %v369_v17 = vld [vmem:[%s1466_s0 + $0x2b] sm:$0x1]  ;;  %v384_v18 = vrot.slane %v367_v9, 5  ;;  %v386_v19 = vrot.slane %v368_v11, 4  ;;  %v280_v20 = vsel %vm65_vm3, %v279_v0, %v278_v6  ;;  %v265_v23 = vld [vmem:[%s1466_s0 + $0x32] sm:$0x1] }
  0x11   :  { %1007 = vmatprep.subr.bf16.mxu0 %v1097_v3  ;;  %1019 = vmatprep.subr.bf16.mxu1 %v1097_v3  ;;  %v183_v12 = vsel %vm77_vm7, %v182_v56, %v181_v5  ;;  %v381_v21 = vsel %vm59_vm1, %v380_v14, %v364_v7  ;;  %v283_v24 = vrot.slane %v264_v13, 3  ;;  %v370_v25 = vld [vmem:[%s1466_s0 + $0x33] sm:$0x1]  ;;  %v388_v28 = vrot.slane %v369_v17, 3  ;;  %v470_v31 = vld [vmem:[%s1466_s0 + $0xc] sm:$0x1] }
  0x12   :  { %v383_v22 = vsel %vm62_vm2, %v382_v15, %v381_v21  ;;  %v282_v29 = vsel %vm68_vm4, %v281_v16, %v280_v20 }
  0x13   :  { %867 = vmatmul.mubr.msk.f32.vlgmr.msra.gmra.mrb[0].mxu0 %vm79_vm8, %v78_v61  ;;  %886 = vmatmul.mubr.msk.f32.vlgmr.msra.gmra.mrb[0].mxu1 %vm79_vm8, %v183_v12  ;;  %v385_v27 = vsel %vm65_vm3, %v384_v18, %v383_v22 }
  0x14   :  { %1009 = vmatpush3.bf16.msra.mxu0 %v1152_v4  ;;  %1021 = vmatpush3.bf16.msra.mxu1 %v1152_v4  ;;  %v387_v30 = vsel %vm68_vm4, %v386_v19, %v385_v27 }
  0x15   :  { %1010 = vmatprep.subr.bf16.mxu0 %v1097_v3  ;;  %1022 = vmatprep.subr.bf16.mxu1 %v1097_v3 }
  0x16   :  { %904 = vmatprep.mubr.msk.f32.mxu0 %vm1098_vm0, %v1099_v8  ;;  %923 = vmatprep.mubr.msk.f32.mxu1 %vm1098_vm0, %v1099_v8 }
  0x18   :  { %1012 = vmatpush3.bf16.msra.mxu0 %v1172_v10  ;;  %1024 = vmatpush3.bf16.msra.mxu1 %v1172_v10 }
  0x19   :  { %12 = vsyncpa [#allocation3], 0  ;;  %1013 = vmatprep.subr.bf16.mxu0 %v1097_v3  ;;  %1025 = vmatprep.subr.bf16.mxu1 %v1097_v3  ;;  %v266_v32 = vld [vmem:[%s1466_s0 + $0x3a] sm:$0x1]  ;;  %v285_v33 = vrot.slane %v265_v23, 2  ;;  %v390_v35 = vrot.slane %v370_v25, 2  ;;  %v284_v36 = vsel %vm71_vm5, %v283_v24, %v282_v29  ;;  %v389_v37 = vsel %vm71_vm5, %v388_v28, %v387_v30 }
  0x1a   :  { %v371_v34 = vld [vmem:[%s1466_s0 + $0x3b] sm:$0x1]  ;;  %v471_v38 = vld [vmem:[%s1466_s0 + $0x14] sm:$0x1]  ;;  %v485_v40 = vrot.slane %v470_v31, 7  ;;  %v287_v42 = vrot.slane %v266_v32, 1 }
  0x1b   :  { %v469_v41 = vld [vmem:[%s1466_s0 + $0x4] sm:$0x1]  ;;  %v392_v43 = vrot.slane %v371_v34, 1  ;;  %v286_v44 = vsel %vm74_vm6, %v285_v33, %v284_v36  ;;  %v391_v45 = vsel %vm74_vm6, %v390_v35, %v389_v37  ;;  %v472_v46 = vld [vmem:[%s1466_s0 + $0x1c] sm:$0x1]  ;;  %v487_v47 = vrot.slane %v471_v38, 6 }
  0x1c   :  { %1015 = vmatpush3.bf16.msra.mxu0 %v1205_v26  ;;  %1027 = vmatpush3.bf16.msra.mxu1 %v1205_v26  ;;  %v486_v48 = vsel %vm59_vm1, %v485_v40, %v469_v41  ;;  %v288_v49 = vsel %vm77_vm7, %v287_v42, %v286_v44  ;;  %v473_v51 = vld [vmem:[%s1466_s0 + $0x24] sm:$0x1]  ;;  %v489_v52 = vrot.slane %v472_v46, 5  ;;  %v474_v54 = vld [vmem:[%s1466_s0 + $0x2c] sm:$0x1]  ;;  %v577_v2 = vld [vmem:[%s1469_s3 + $0x18] sm:$0xff] }
  0x1d   :  { %1016 = vmatprep.subr.bf16.mxu0 %v1097_v3  ;;  %1028 = vmatprep.subr.bf16.mxu1 %v1097_v3  ;;  %v393_v50 = vsel %vm77_vm7, %v392_v43, %v391_v45  ;;  %v488_v53 = vsel %vm62_vm2, %v487_v47, %v486_v48  ;;  %v491_v55 = vrot.slane %v473_v51, 4  ;;  %v475_v57 = vld [vmem:[%s1466_s0 + $0x34] sm:$0x1]  ;;  %v493_v58 = vrot.slane %v474_v54, 3  ;;  %v575_v0 = vld [vmem:[%s1469_s3 + $0x8] sm:$0xff]  ;;  %v581_v11 = vld [vmem:[%s1469_s3 + $0x38] sm:$0xff] }
  0x1e   :  { %v490_v56 = vsel %vm65_vm3, %v489_v52, %v488_v53  ;;  %v495_v60 = vrot.slane %v475_v57, 2  ;;  %v579_v6 = vld [vmem:[%s1469_s3 + $0x28] sm:$0xff]  ;;  %v580_v9 = vld [vmem:[%s1469_s3 + $0x30] sm:$0xff]  ;;  %v664_v13 = vld [vmem:[%s1471_s5] sm:$0xff]  ;;  %vm755_vm9 = vcmask 261120  }
  0x1f   :  { %v492_v59 = vsel %vm68_vm4, %v491_v55, %v490_v56  ;;  %v1053_v12 = vpack.c.bf16 %v581_v11, %v580_v9  ;;  %v665_v14 = vld [vmem:[%s1471_s5 + $0x8] sm:$0xff]  ;;  %v666_v15 = vld [vmem:[%s1471_s5 + $0x10] sm:$0xff]  ;;  %v667_v17 = vld [vmem:[%s1471_s5 + $0x18] sm:$0xff] }
  0x20   :  { %1018 = vmatpush3.bf16.msra.mxu0 %v1233_v39  ;;  %1030 = vmatpush3.bf16.msra.mxu1 %v1233_v39  ;;  %v494_v61 = vsel %vm71_vm5, %v493_v58, %v492_v59  ;;  %v1056_v16 = vpack.c.bf16 %v665_v14, %v664_v13  ;;  %v1059_v18 = vpack.c.bf16 %v667_v17, %v666_v15  ;;  %v777_v19 = vld [vmem:[%s1468_s2] ss:$0 sm:$0xff]  ;;  %v669_v52 = vld [vmem:[%s1471_s5 + $0x28] sm:$0xff]  ;;  %v670_v54 = vld [vmem:[%s1471_s5 + $0x30] sm:$0xff] }
  0x21   :  { %1031 = vmatprep.subr.bf16.mxu0 %v1097_v3  ;;  %1043 = vmatprep.subr.bf16.mxu1 %v1097_v3  ;;  %v496_v63 = vsel %vm74_vm6, %v495_v60, %v494_v61  ;;  %v668_v51 = vld [vmem:[%s1471_s5 + $0x20] sm:$0xff]  ;;  %v671_v55 = vld [vmem:[%s1471_s5 + $0x38] sm:$0xff] }
  0x22   :  { %v1062_v53 = vpack.c.bf16 %v669_v52, %v668_v51  ;;  %v1065_v56 = vpack.c.bf16 %v671_v55, %v670_v54  ;;  %v783_v57 = vld [vmem:[%s1470_s4] ss:$0 sm:$0xff]  ;;  %s1100_s4 = smov [#allocation2]  }
  0x23   :  { %905 = vmatmul.mubr.msk.f32.vlgmr.msra.gmra.mrb[2].mxu0 %vm79_vm8, %v288_v49  ;;  %924 = vmatmul.mubr.msk.f32.vlgmr.msra.gmra.mrb[2].mxu1 %vm79_vm8, %v393_v50  ;;  %s769_s5 = sshll.u32 %s1100_s4, 4  ;;  %s770_s5 = int_to_ptr.vmem [resolvable:$true] %s769_s5 }
  0x24   :  { %1033 = vmatpush3.bf16.msra.mxu0 %v1152_v4  ;;  %942 = vmatprep.mubr.msk.f32.mxu0 %vm1098_vm0, %v1099_v8  ;;  %v476_v4 = vld [vmem:[%s1466_s0 + $0x3c] sm:$0x1]  ;;  %s1073_s11 = scalar_lea.vmem %s770_s5, 128  ;;  %p1078_p1 = scmp.lt.s32.totalorder %s770_s5, %s770_s5 }
  0x25   :  { %1034 = vmatprep.subr.bf16.mxu0 %v1097_v3  ;;  %961 = vmatprep.mubr.msk.f32.mxu1 %vm1098_vm0, %v1099_v8  ;;  %v497_v62 = vrot.slane %v476_v4, 1  ;;  %p1074_p0 = scmp.ne.s32.totalorder %s770_s5, %s1073_s11  ;;  %p1079_p2 = scmp.lt.s32.totalorder %s1073_s11, %s1073_s11 }
  0x27   :  { %p1080_p3 = por %p1079_p2, %p1078_p1 }
  0x28   :  { %1036 = vmatpush3.bf16.msra.mxu0 %v1172_v10  ;;  %v498_v10 = vsel %vm77_vm7, %v497_v62, %v496_v63 }
  0x29   :  { %1037 = vmatprep.subr.bf16.mxu0 %v1097_v3  ;;  %p1081_p4 = pnand %p1080_p3, %p1074_p0 }
  0x2c   :  { %1039 = vmatpush3.bf16.msra.mxu0 %v1205_v26  ;;  %v574_v26 = vld [vmem:[%s1469_s3] sm:$0xff] }
  0x2d   :  { %1040 = vmatprep.subr.bf16.mxu0 %v1097_v3  ;;  %v1044_v1 = vpack.c.bf16 %v575_v0, %v574_v26 }
  0x2f   :  { %1045 = vmatpush3.bf16.msra.mxu1 %v1044_v1 }
  0x30   :  { %1042 = vmatpush3.bf16.msra.mxu0 %v1233_v39  ;;  %v576_v39 = vld [vmem:[%s1469_s3 + $0x10] sm:$0xff]  ;;  %1046 = vmatprep.subr.bf16.mxu1 %v1097_v3 }
  0x31   :  { %1055 = vmatprep.subr.bf16.mxu0 %v1097_v3  ;;  %v1047_v5 = vpack.c.bf16 %v577_v2, %v576_v39 }
  0x33   :  { %943 = vmatmul.mubr.msk.f32.vlgmr.msra.gmra.mrb[4].mxu0 %vm79_vm8, %v498_v10  ;;  %1048 = vmatpush3.bf16.msra.mxu1 %v1047_v5 }
  0x34   :  { %980 = vmatprep.mubr.msk.f32.mxu0 %vm1098_vm0, %v1099_v8  ;;  %1049 = vmatprep.subr.bf16.mxu1 %v1097_v3  ;;  %v578_v8 = vld [vmem:[%s1469_s3 + $0x20] sm:$0xff] }
  0x35   :  { %v1050_v7 = vpack.c.bf16 %v579_v6, %v578_v8  ;;  %1057 = vmatpush3.bf16.msra.mxu0 %v1056_v16 }
  0x36   :  { %1058 = vmatprep.subr.bf16.mxu0 %v1097_v3 }
  0x37   :  { %1051 = vmatpush3.bf16.msra.mxu1 %v1050_v7 }
  0x38   :  { %1052 = vmatprep.subr.bf16.mxu1 %v1097_v3 }
  0x39   :  { %1060 = vmatpush3.bf16.msra.mxu0 %v1059_v18 }
  0x3a   :  { %1061 = vmatprep.subr.bf16.mxu0 %v1097_v3 }
  0x3b   :  { %1054 = vmatpush3.bf16.msra.mxu1 %v1053_v12 }
  0x3d   :  { %1063 = vmatpush3.bf16.msra.mxu0 %v1062_v53 }
  0x3e   :  { %1064 = vmatprep.subr.bf16.mxu0 %v1097_v3  ;;  %v785_v3 = vld [vmem:[%s1472_s6] ss:$0 sm:$0xff] }
  0x41   :  { %1066 = vmatpush3.bf16.msra.mxu0 %v1065_v56 }
  0xe6   :  { %v148_v20 = vpop.f32.mrb[0].mxu0  ;;  %v252_v21 = vpop.f32.mrb[0].mxu1 }
  0xe7   :  { %v149_v22 = vadd.f32 %v777_v19, %v148_v20  ;;  %v253_v23 = vadd.f32 %v777_v19, %v252_v21  ;;  %v868_v24 = vpop.f32.mrb[1].mxu0  ;;  %v887_v25 = vpop.f32.mrb[1].mxu1 }
  0xe9   :  { %v152_v27 = vmul.f32 0.01, %v149_v22  ;;  %v256_v28 = vmul.f32 0.01, %v253_v23 }
  0xeb   :  { %v153_v29 = vmax.f32 %v149_v22, %v152_v27  ;;  %v257_v30 = vmax.f32 %v253_v23, %v256_v28 }
  0xed   :  { %v258_v31 = vmax.f32 %v153_v29, %v257_v30 }
  0xf6   :  { %v357_v32 = vpop.f32.mrb[2].mxu0  ;;  %v462_v33 = vpop.f32.mrb[2].mxu1 }
  0xf7   :  { %v358_v34 = vadd.f32 %v777_v19, %v357_v32  ;;  %v906_v35 = vpop.f32.mrb[3].mxu0  ;;  %v463_v36 = vadd.f32 %v777_v19, %v462_v33  ;;  %v925_v37 = vpop.f32.mrb[3].mxu1 }
  0xf9   :  { %v361_v38 = vmul.f32 0.01, %v358_v34  ;;  %v466_v40 = vmul.f32 0.01, %v463_v36 }
  0xfb   :  { %v362_v41 = vmax.f32 %v358_v34, %v361_v38  ;;  %v467_v42 = vmax.f32 %v463_v36, %v466_v40 }
  0xfd   :  { %v363_v43 = vmax.f32 %v258_v31, %v362_v41 }
  0xff   :  { %v468_v44 = vmax.f32 %v363_v43, %v467_v42 }
 0x106   :  { %v567_v45 = vpop.f32.mrb[4].mxu0 }
 0x107   :  { %v568_v46 = vadd.f32 %v777_v19, %v567_v45  ;;  %v944_v47 = vpop.f32.mrb[5].mxu0 }
 0x109   :  { %v571_v48 = vmul.f32 0.01, %v568_v46 }
 0x10b   :  { %v572_v49 = vmax.f32 %v568_v46, %v571_v48 }
 0x10d   :  { %v573_v50 = vmax.f32 %v468_v44, %v572_v49 }
 0x10f   :  { %962 = vmatmul.mubr.msk.f32.vlgmr.msra.gmra.mrb[4].mxu1 %vm79_vm8, %v573_v50 }
 0x1e2   :  { %v658_v58 = vpop.f32.mrb[4].mxu1 }
 0x1e3   :  { %v659_v59 = vadd.f32 %v783_v57, %v658_v58  ;;  %v963_v4 = vpop.f32.mrb[5].mxu1 }
 0x1e5   :  { %v662_v60 = vmul.f32 0.01, %v659_v59 }
 0x1e7   :  { %v663_v61 = vmax.f32 %v659_v59, %v662_v60 }
 0x1e9   :  { %981 = vmatmul.mubr.msk.f32.vlgmr.msra.gmra.mrb[6].mxu0 %vm79_vm8, %v663_v61 }
 0x2bc   :  { %v748_v62 = vpop.f32.mrb[6].mxu0 }
 0x2bd   :  { %v749_v63 = vadd.f32 %v785_v3, %v748_v62  ;;  %v982_v10 = vpop.f32.mrb[7].mxu0 }
 0x2bf   :  { %v752_v26 = vmul.f32 0.01, %v749_v63 }
 0x2c1   :  { %v753_v0 = vmax.f32 %v749_v63, %v752_v26 }
 0x2c3   :  { %v754_v1 = vmul.f32 %v753_v0, %v753_v0 }
 0x2c5   :  { %v756_v39 = vsel %vm755_vm9, %v754_v1, 0.0 }
 0x2c6   :  { %757 = vadd.xlane.f32.xlu0 %v756_v39 }
 0x353   :  { %v758_v2 = vpop.xlane.xlu0 %757 }
 0x354   :  { %v759_v5 = vmax.f32 %v758_v2, 1e-24 }
 0x356   :  { %1071 = vrsqrt.f32 %v759_v5 }
 0x360   :  { %v1072_v8 = vpop.eup %1071 }
 0x361   :  { %v761_v6 = vmul.f32 %v1072_v8, %v753_v0 }
 0x363   :  { %762 = vst.msk [vmem:[#allocation2] sm:$0xff] %vm755_vm9, %v761_v6 }
 0x364   :  { %1084 = shalt.err (!%p1081_p4)
}
 0x365   :  { %s1085_s13 = scalar_lea.hbm %s1473_s7, 128 }
 0x366   :  { %p1086_p5 = scmp.ne.s32.totalorder %s1473_s7, %s1085_s13  ;;  %p1089_p6 = scmp.lt.u32.totalorder %s1085_s13, %s1473_s7 }
 0x368   :  { %p1091_p7 = pnand %p1089_p6, %p1086_p5 }
 0x36a   :  { %1094 = shalt.err (!%p1091_p7)
}
 0x36b   :  { %772 = dma.vmem_to_hbm [thread:$0]  %s770_s5, 128, %s1473_s7, [#allocation3]  }
 0x36c   :  { %1095 = dma.done.wait [#allocation3], 128  }
 0x36d   :  { %1096 = vsyncadd [#allocation3], 4294967168 }
 0x36e   :  { %776 = vsyncpa [#allocation3], 1 }

// kernel: tpu_custom_call.1
= control target key start
LH: loop header
LB: loop body
LE: loop exit
PB: predicated region body
PF: predicated region fallthrough
CT: control target
= control target key end

     0   :  { %v1097_v3 = vmov 0.0|0.0   ;;  %vm1098_vm0 = vmmov 0   ;;  %v1099_v8 = vmov 0.0   ;;  %vm59_vm1 = vcmask 1041409   ;;  %s1466_s0 = inlined_call_operand.vmem [shape: f32[8,5,64], index: 0, kind: input, shape index: {}]   ;;  %s1467_s1 = inlined_call_operand.vmem [shape: f32[64,64], index: 1, kind: input, shape index: {}]   ;;  %s1468_s2 = inlined_call_operand.vmem [shape: f32[1,64], index: 2, kind: input, shape index: {}]   ;;  %s1469_s3 = inlined_call_operand.vmem [shape: f32[64,64], index: 3, kind: input, shape index: {}]   ;;  %s1470_s4 = inlined_call_operand.vmem [shape: f32[1,64], index: 4, kind: input, shape index: {}]   ;;  %s1471_s5 = inlined_call_operand.vmem [shape: f32[64,32], index: 5, kind: input, shape index: {}]   ;;  %s1472_s6 = inlined_call_operand.vmem [shape: f32[1,32], index: 6, kind: input, shape index: {}]   ;;  %s1473_s7 = inlined_call_operand.hbm [shape: f32[8,32], index: 7, kind: output, shape index: {}]  }
   0x1   :  { %v35_v0 = vld [vmem:[%s1467_s1] sm:$0xff]  ;;  %v36_v1 = vld [vmem:[%s1467_s1 + $0x8] sm:$0xff]  ;;  %v37_v2 = vld [vmem:[%s1467_s1 + $0x10] sm:$0xff]  ;;  %983 = vmatprep.subr.bf16.mxu0 %v1097_v3  ;;  %995 = vmatprep.subr.bf16.mxu1 %v1097_v3  ;;  %vm62_vm2 = vcmask 1042434   ;;  %vm65_vm3 = vcmask 1043459   ;;  %vm68_vm4 = vcmask 1044484  }
   0x2   :  { %v1152_v4 = vpack.c.bf16 %v36_v1, %v35_v0  ;;  %v38_v5 = vld [vmem:[%s1467_s1 + $0x18] sm:$0xff]  ;;  %v39_v6 = vld [vmem:[%s1467_s1 + $0x20] sm:$0xff]  ;;  %v40_v7 = vld [vmem:[%s1467_s1 + $0x28] sm:$0xff]  ;;  %866 = vmatprep.mubr.msk.f32.mxu0 %vm1098_vm0, %v1099_v8  ;;  %885 = vmatprep.mubr.msk.f32.mxu1 %vm1098_vm0, %v1099_v8  ;;  %vm71_vm5 = vcmask 1045509   ;;  %vm74_vm6 = vcmask 1046534   ;;  %vm77_vm7 = vcmask 1047559  }
   0x3   :  { %v27_v9 = vld [vmem:[%s1466_s0] sm:$0x1]  ;;  %v1172_v10 = vpack.c.bf16 %v38_v5, %v37_v2  ;;  %v28_v11 = vld [vmem:[%s1466_s0 + $0x8] sm:$0x1]  ;;  %v29_v12 = vld [vmem:[%s1466_s0 + $0x10] sm:$0x1]  ;;  %v1205_v26 = vpack.c.bf16 %v40_v7, %v39_v6 }
   0x4   :  { %985 = vmatpush3.bf16.msra.mxu0 %v1152_v4  ;;  %997 = vmatpush3.bf16.msra.mxu1 %v1152_v4  ;;  %v30_v13 = vld [vmem:[%s1466_s0 + $0x18] sm:$0x1]  ;;  %v31_v14 = vld [vmem:[%s1466_s0 + $0x20] sm:$0x1]  ;;  %v32_v15 = vld [vmem:[%s1466_s0 + $0x28] sm:$0x1] }
   0x5   :  { %986 = vmatprep.subr.bf16.mxu0 %v1097_v3  ;;  %998 = vmatprep.subr.bf16.mxu1 %v1097_v3  ;;  %v33_v16 = vld [vmem:[%s1466_s0 + $0x30] sm:$0x1]  ;;  %v42_v18 = vld [vmem:[%s1467_s1 + $0x38] sm:$0xff]  ;;  %v58_v19 = vrot.slane %v28_v11, 7  ;;  %v61_v20 = vrot.slane %v29_v12, 6  ;;  %v64_v21 = vrot.slane %v30_v13, 5 }
   0x6   :  { %v41_v17 = vld [vmem:[%s1467_s1 + $0x30] sm:$0xff]  ;;  %v34_v22 = vld [vmem:[%s1466_s0 + $0x38] sm:$0x1]  ;;  %v67_v23 = vrot.slane %v31_v14, 4  ;;  %v70_v24 = vrot.slane %v32_v15, 3  ;;  %v73_v25 = vrot.slane %v33_v16, 2 }
   0x7   :  { %v60_v27 = vsel %vm59_vm1, %v58_v19, %v27_v9  ;;  %v154_v28 = vld [vmem:[%s1466_s0 + $0x1] sm:$0x1]  ;;  %v155_v29 = vld [vmem:[%s1466_s0 + $0x9] sm:$0x1]  ;;  %v156_v30 = vld [vmem:[%s1466_s0 + $0x11] sm:$0x1]  ;;  %v1233_v39 = vpack.c.bf16 %v42_v18, %v41_v17 }
   0x8   :  { %988 = vmatpush3.bf16.msra.mxu0 %v1172_v10  ;;  %1000 = vmatpush3.bf16.msra.mxu1 %v1172_v10  ;;  %v63_v31 = vsel %vm62_vm2, %v61_v20, %v60_v27  ;;  %v157_v32 = vld [vmem:[%s1466_s0 + $0x19] sm:$0x1]  ;;  %v158_v33 = vld [vmem:[%s1466_s0 + $0x21] sm:$0x1]  ;;  %v159_v34 = vld [vmem:[%s1466_s0 + $0x29] sm:$0x1] }
   0x9   :  { %989 = vmatprep.subr.bf16.mxu0 %v1097_v3  ;;  %1001 = vmatprep.subr.bf16.mxu1 %v1097_v3  ;;  %v66_v35 = vsel %vm65_vm3, %v64_v21, %v63_v31  ;;  %v160_v36 = vld [vmem:[%s1466_s0 + $0x31] sm:$0x1]  ;;  %v170_v37 = vrot.slane %v155_v29, 7  ;;  %v172_v38 = vrot.slane %v156_v30, 6  ;;  %v161_v41 = vld [vmem:[%s1466_s0 + $0x39] sm:$0x1] }
   0xa   :  { %v69_v40 = vsel %vm68_vm4, %v67_v23, %v66_v35  ;;  %v174_v42 = vrot.slane %v157_v32, 5  ;;  %v176_v43 = vrot.slane %v158_v33, 4  ;;  %v76_v45 = vrot.slane %v34_v22, 1  ;;  %v260_v48 = vld [vmem:[%s1466_s0 + $0xa] sm:$0x1] }
   0xb   :  { %v72_v44 = vsel %vm71_vm5, %v70_v24, %v69_v40  ;;  %v171_v46 = vsel %vm59_vm1, %v170_v37, %v154_v28  ;;  %v178_v47 = vrot.slane %v159_v34, 3  ;;  %v261_v49 = vld [vmem:[%s1466_s0 + $0x12] sm:$0x1]  ;;  %v180_v52 = vrot.slane %v160_v36, 2  ;;  %v259_v53 = vld [vmem:[%s1466_s0 + $0x2] sm:$0x1] }
   0xc   :  { %991 = vmatpush3.bf16.msra.mxu0 %v1205_v26  ;;  %1003 = vmatpush3.bf16.msra.mxu1 %v1205_v26  ;;  %v75_v50 = vsel %vm74_vm6, %v73_v25, %v72_v44  ;;  %v173_v51 = vsel %vm62_vm2, %v172_v38, %v171_v46  ;;  %v262_v54 = vld [vmem:[%s1466_s0 + $0x1a] sm:$0x1]  ;;  %v182_v56 = vrot.slane %v161_v41, 1  ;;  %v275_v57 = vrot.slane %v260_v48, 7  ;;  %v263_v60 = vld [vmem:[%s1466_s0 + $0x22] sm:$0x1] }
   0xd   :  { %992 = vmatprep.subr.bf16.mxu0 %v1097_v3  ;;  %1004 = vmatprep.subr.bf16.mxu1 %v1097_v3  ;;  %v175_v55 = vsel %vm65_vm3, %v174_v42, %v173_v51  ;;  %v277_v58 = vrot.slane %v261_v49, 6  ;;  %vm79_vm8 = vcmask 523264   ;;  %v78_v61 = vsel %vm77_vm7, %v76_v45, %v75_v50  ;;  %v365_v1 = vld [vmem:[%s1466_s0 + $0xb] sm:$0x1]  ;;  %v366_v2 = vld [vmem:[%s1466_s0 + $0x13] sm:$0x1] }
   0xe   :  { %v177_v59 = vsel %vm68_vm4, %v176_v43, %v175_v55  ;;  %v276_v63 = vsel %vm59_vm1, %v275_v57, %v259_v53  ;;  %v279_v0 = vrot.slane %v262_v54, 5  ;;  %v364_v7 = vld [vmem:[%s1466_s0 + $0x3] sm:$0x1]  ;;  %v367_v9 = vld [vmem:[%s1466_s0 + $0x1b] sm:$0x1]  ;;  %v380_v14 = vrot.slane %v365_v1, 7 }
   0xf   :  { %v179_v62 = vsel %vm71_vm5, %v178_v47, %v177_v59  ;;  %v278_v6 = vsel %vm62_vm2, %v277_v58, %v276_v63  ;;  %v368_v11 = vld [vmem:[%s1466_s0 + $0x23] sm:$0x1]  ;;  %v264_v13 = vld [vmem:[%s1466_s0 + $0x2a] sm:$0x1]  ;;  %v382_v15 = vrot.slane %v366_v2, 6  ;;  %v281_v16 = vrot.slane %v263_v60, 4 }
  0x10   :  { %994 = vmatpush3.bf16.msra.mxu0 %v1233_v39  ;;  %1006 = vmatpush3.bf16.msra.mxu1 %v1233_v39  ;;  %v181_v5 = vsel %vm74_vm6, %v180_v52, %v179_v62  ;;  %v369_v17 = vld [vmem:[%s1466_s0 + $0x2b] sm:$0x1]  ;;  %v384_v18 = vrot.slane %v367_v9, 5  ;;  %v386_v19 = vrot.slane %v368_v11, 4  ;;  %v280_v20 = vsel %vm65_vm3, %v279_v0, %v278_v6  ;;  %v265_v23 = vld [vmem:[%s1466_s0 + $0x32] sm:$0x1] }
  0x11   :  { %1007 = vmatprep.subr.bf16.mxu0 %v1097_v3  ;;  %1019 = vmatprep.subr.bf16.mxu1 %v1097_v3  ;;  %v183_v12 = vsel %vm77_vm7, %v182_v56, %v181_v5  ;;  %v381_v21 = vsel %vm59_vm1, %v380_v14, %v364_v7  ;;  %v283_v24 = vrot.slane %v264_v13, 3  ;;  %v370_v25 = vld [vmem:[%s1466_s0 + $0x33] sm:$0x1]  ;;  %v388_v28 = vrot.slane %v369_v17, 3  ;;  %v470_v31 = vld [vmem:[%s1466_s0 + $0xc] sm:$0x1] }
  0x12   :  { %v383_v22 = vsel %vm62_vm2, %v382_v15, %v381_v21  ;;  %v282_v29 = vsel %vm68_vm4, %v281_v16, %v280_v20 }
  0x13   :  { %867 = vmatmul.mubr.msk.f32.vlgmr.msra.gmra.mrb[0].mxu0 %vm79_vm8, %v78_v61  ;;  %886 = vmatmul.mubr.msk.f32.vlgmr.msra.gmra.mrb[0].mxu1 %vm79_vm8, %v183_v12  ;;  %v385_v27 = vsel %vm65_vm3, %v384_v18, %v383_v22 }
  0x14   :  { %1009 = vmatpush3.bf16.msra.mxu0 %v1152_v4  ;;  %1021 = vmatpush3.bf16.msra.mxu1 %v1152_v4  ;;  %v387_v30 = vsel %vm68_vm4, %v386_v19, %v385_v27 }
  0x15   :  { %1010 = vmatprep.subr.bf16.mxu0 %v1097_v3  ;;  %1022 = vmatprep.subr.bf16.mxu1 %v1097_v3 }
  0x16   :  { %904 = vmatprep.mubr.msk.f32.mxu0 %vm1098_vm0, %v1099_v8  ;;  %923 = vmatprep.mubr.msk.f32.mxu1 %vm1098_vm0, %v1099_v8 }
  0x18   :  { %1012 = vmatpush3.bf16.msra.mxu0 %v1172_v10  ;;  %1024 = vmatpush3.bf16.msra.mxu1 %v1172_v10 }
  0x19   :  { %12 = vsyncpa [#allocation3], 0  ;;  %1013 = vmatprep.subr.bf16.mxu0 %v1097_v3  ;;  %1025 = vmatprep.subr.bf16.mxu1 %v1097_v3  ;;  %v266_v32 = vld [vmem:[%s1466_s0 + $0x3a] sm:$0x1]  ;;  %v285_v33 = vrot.slane %v265_v23, 2  ;;  %v390_v35 = vrot.slane %v370_v25, 2  ;;  %v284_v36 = vsel %vm71_vm5, %v283_v24, %v282_v29  ;;  %v389_v37 = vsel %vm71_vm5, %v388_v28, %v387_v30 }
  0x1a   :  { %v371_v34 = vld [vmem:[%s1466_s0 + $0x3b] sm:$0x1]  ;;  %v471_v38 = vld [vmem:[%s1466_s0 + $0x14] sm:$0x1]  ;;  %v485_v40 = vrot.slane %v470_v31, 7  ;;  %v287_v42 = vrot.slane %v266_v32, 1 }
  0x1b   :  { %v469_v41 = vld [vmem:[%s1466_s0 + $0x4] sm:$0x1]  ;;  %v392_v43 = vrot.slane %v371_v34, 1  ;;  %v286_v44 = vsel %vm74_vm6, %v285_v33, %v284_v36  ;;  %v391_v45 = vsel %vm74_vm6, %v390_v35, %v389_v37  ;;  %v472_v46 = vld [vmem:[%s1466_s0 + $0x1c] sm:$0x1]  ;;  %v487_v47 = vrot.slane %v471_v38, 6 }
  0x1c   :  { %1015 = vmatpush3.bf16.msra.mxu0 %v1205_v26  ;;  %1027 = vmatpush3.bf16.msra.mxu1 %v1205_v26  ;;  %v486_v48 = vsel %vm59_vm1, %v485_v40, %v469_v41  ;;  %v288_v49 = vsel %vm77_vm7, %v287_v42, %v286_v44  ;;  %v473_v51 = vld [vmem:[%s1466_s0 + $0x24] sm:$0x1]  ;;  %v489_v52 = vrot.slane %v472_v46, 5  ;;  %v474_v54 = vld [vmem:[%s1466_s0 + $0x2c] sm:$0x1]  ;;  %v577_v2 = vld [vmem:[%s1469_s3 + $0x18] sm:$0xff] }
  0x1d   :  { %1016 = vmatprep.subr.bf16.mxu0 %v1097_v3  ;;  %1028 = vmatprep.subr.bf16.mxu1 %v1097_v3  ;;  %v393_v50 = vsel %vm77_vm7, %v392_v43, %v391_v45  ;;  %v488_v53 = vsel %vm62_vm2, %v487_v47, %v486_v48  ;;  %v491_v55 = vrot.slane %v473_v51, 4  ;;  %v475_v57 = vld [vmem:[%s1466_s0 + $0x34] sm:$0x1]  ;;  %v493_v58 = vrot.slane %v474_v54, 3  ;;  %v575_v0 = vld [vmem:[%s1469_s3 + $0x8] sm:$0xff]  ;;  %v581_v11 = vld [vmem:[%s1469_s3 + $0x38] sm:$0xff] }
  0x1e   :  { %v490_v56 = vsel %vm65_vm3, %v489_v52, %v488_v53  ;;  %v495_v60 = vrot.slane %v475_v57, 2  ;;  %v579_v6 = vld [vmem:[%s1469_s3 + $0x28] sm:$0xff]  ;;  %v580_v9 = vld [vmem:[%s1469_s3 + $0x30] sm:$0xff]  ;;  %v664_v13 = vld [vmem:[%s1471_s5] sm:$0xff]  ;;  %vm755_vm9 = vcmask 261120  }
  0x1f   :  { %v492_v59 = vsel %vm68_vm4, %v491_v55, %v490_v56  ;;  %v1053_v12 = vpack.c.bf16 %v581_v11, %v580_v9  ;;  %v665_v14 = vld [vmem:[%s1471_s5 + $0x8] sm:$0xff]  ;;  %v666_v15 = vld [vmem:[%s1471_s5 + $0x10] sm:$0xff]  ;;  %v667_v17 = vld [vmem:[%s1471_s5 + $0x18] sm:$0xff] }
  0x20   :  { %1018 = vmatpush3.bf16.msra.mxu0 %v1233_v39  ;;  %1030 = vmatpush3.bf16.msra.mxu1 %v1233_v39  ;;  %v494_v61 = vsel %vm71_vm5, %v493_v58, %v492_v59  ;;  %v1056_v16 = vpack.c.bf16 %v665_v14, %v664_v13  ;;  %v1059_v18 = vpack.c.bf16 %v667_v17, %v666_v15  ;;  %v777_v19 = vld [vmem:[%s1468_s2] ss:$0 sm:$0xff]  ;;  %v669_v52 = vld [vmem:[%s1471_s5 + $0x28] sm:$0xff]  ;;  %v670_v54 = vld [vmem:[%s1471_s5 + $0x30] sm:$0xff] }
  0x21   :  { %1031 = vmatprep.subr.bf16.mxu0 %v1097_v3  ;;  %1043 = vmatprep.subr.bf16.mxu1 %v1097_v3  ;;  %v496_v63 = vsel %vm74_vm6, %v495_v60, %v494_v61  ;;  %v668_v51 = vld [vmem:[%s1471_s5 + $0x20] sm:$0xff]  ;;  %v671_v55 = vld [vmem:[%s1471_s5 + $0x38] sm:$0xff] }
  0x22   :  { %v1062_v53 = vpack.c.bf16 %v669_v52, %v668_v51  ;;  %v1065_v56 = vpack.c.bf16 %v671_v55, %v670_v54  ;;  %v783_v57 = vld [vmem:[%s1470_s4] ss:$0 sm:$0xff]  ;;  %s1100_s4 = smov [#allocation2]  }
  0x23   :  { %905 = vmatmul.mubr.msk.f32.vlgmr.msra.gmra.mrb[2].mxu0 %vm79_vm8, %v288_v49  ;;  %924 = vmatmul.mubr.msk.f32.vlgmr.msra.gmra.mrb[2].mxu1 %vm79_vm8, %v393_v50  ;;  %s769_s5 = sshll.u32 %s1100_s4, 4  ;;  %s770_s5 = int_to_ptr.vmem [resolvable:$true] %s769_s5 }
  0x24   :  { %1033 = vmatpush3.bf16.msra.mxu0 %v1152_v4  ;;  %942 = vmatprep.mubr.msk.f32.mxu0 %vm1098_vm0, %v1099_v8  ;;  %v476_v4 = vld [vmem:[%s1466_s0 + $0x3c] sm:$0x1]  ;;  %s1073_s11 = scalar_lea.vmem %s770_s5, 128  ;;  %p1078_p1 = scmp.lt.s32.totalorder %s770_s5, %s770_s5 }
  0x25   :  { %1034 = vmatprep.subr.bf16.mxu0 %v1097_v3  ;;  %961 = vmatprep.mubr.msk.f32.mxu1 %vm1098_vm0, %v1099_v8  ;;  %v497_v62 = vrot.slane %v476_v4, 1  ;;  %p1074_p0 = scmp.ne.s32.totalorder %s770_s5, %s1073_s11  ;;  %p1079_p2 = scmp.lt.s32.totalorder %s1073_s11, %s1073_s11 }
  0x27   :  { %p1080_p3 = por %p1079_p2, %p1078_p1 }
  0x28   :  { %1036 = vmatpush3.bf16.msra.mxu0 %v1172_v10  ;;  %v498_v10 = vsel %vm77_vm7, %v497_v62, %v496_v63 }
  0x29   :  { %1037 = vmatprep.subr.bf16.mxu0 %v1097_v3  ;;  %p1081_p4 = pnand %p1080_p3, %p1074_p0 }
  0x2c   :  { %1039 = vmatpush3.bf16.msra.mxu0 %v1205_v26  ;;  %v574_v26 = vld [vmem:[%s1469_s3] sm:$0xff] }
  0x2d   :  { %1040 = vmatprep.subr.bf16.mxu0 %v1097_v3  ;;  %v1044_v1 = vpack.c.bf16 %v575_v0, %v574_v26 }
  0x2f   :  { %1045 = vmatpush3.bf16.msra.mxu1 %v1044_v1 }
  0x30   :  { %1042 = vmatpush3.bf16.msra.mxu0 %v1233_v39  ;;  %v576_v39 = vld [vmem:[%s1469_s3 + $0x10] sm:$0xff]  ;;  %1046 = vmatprep.subr.bf16.mxu1 %v1097_v3 }
  0x31   :  { %1055 = vmatprep.subr.bf16.mxu0 %v1097_v3  ;;  %v1047_v5 = vpack.c.bf16 %v577_v2, %v576_v39 }
  0x33   :  { %943 = vmatmul.mubr.msk.f32.vlgmr.msra.gmra.mrb[4].mxu0 %vm79_vm8, %v498_v10  ;;  %1048 = vmatpush3.bf16.msra.mxu1 %v1047_v5 }
  0x34   :  { %980 = vmatprep.mubr.msk.f32.mxu0 %vm1098_vm0, %v1099_v8  ;;  %1049 = vmatprep.subr.bf16.mxu1 %v1097_v3  ;;  %v578_v8 = vld [vmem:[%s1469_s3 + $0x20] sm:$0xff] }
  0x35   :  { %v1050_v7 = vpack.c.bf16 %v579_v6, %v578_v8  ;;  %1057 = vmatpush3.bf16.msra.mxu0 %v1056_v16 }
  0x36   :  { %1058 = vmatprep.subr.bf16.mxu0 %v1097_v3 }
  0x37   :  { %1051 = vmatpush3.bf16.msra.mxu1 %v1050_v7 }
  0x38   :  { %1052 = vmatprep.subr.bf16.mxu1 %v1097_v3 }
  0x39   :  { %1060 = vmatpush3.bf16.msra.mxu0 %v1059_v18 }
  0x3a   :  { %1061 = vmatprep.subr.bf16.mxu0 %v1097_v3 }
  0x3b   :  { %1054 = vmatpush3.bf16.msra.mxu1 %v1053_v12 }
  0x3d   :  { %1063 = vmatpush3.bf16.msra.mxu0 %v1062_v53 }
  0x3e   :  { %1064 = vmatprep.subr.bf16.mxu0 %v1097_v3  ;;  %v785_v3 = vld [vmem:[%s1472_s6] ss:$0 sm:$0xff] }
  0x41   :  { %1066 = vmatpush3.bf16.msra.mxu0 %v1065_v56 }
  0xe6   :  { %v148_v20 = vpop.f32.mrb[0].mxu0  ;;  %v252_v21 = vpop.f32.mrb[0].mxu1 }
  0xe7   :  { %v149_v22 = vadd.f32 %v777_v19, %v148_v20  ;;  %v253_v23 = vadd.f32 %v777_v19, %v252_v21  ;;  %v868_v24 = vpop.f32.mrb[1].mxu0  ;;  %v887_v25 = vpop.f32.mrb[1].mxu1 }
  0xe9   :  { %v152_v27 = vmul.f32 0.01, %v149_v22  ;;  %v256_v28 = vmul.f32 0.01, %v253_v23 }
  0xeb   :  { %v153_v29 = vmax.f32 %v149_v22, %v152_v27  ;;  %v257_v30 = vmax.f32 %v253_v23, %v256_v28 }
  0xed   :  { %v258_v31 = vmax.f32 %v153_v29, %v257_v30 }
  0xf6   :  { %v357_v32 = vpop.f32.mrb[2].mxu0  ;;  %v462_v33 = vpop.f32.mrb[2].mxu1 }
  0xf7   :  { %v358_v34 = vadd.f32 %v777_v19, %v357_v32  ;;  %v906_v35 = vpop.f32.mrb[3].mxu0  ;;  %v463_v36 = vadd.f32 %v777_v19, %v462_v33  ;;  %v925_v37 = vpop.f32.mrb[3].mxu1 }
  0xf9   :  { %v361_v38 = vmul.f32 0.01, %v358_v34  ;;  %v466_v40 = vmul.f32 0.01, %v463_v36 }
  0xfb   :  { %v362_v41 = vmax.f32 %v358_v34, %v361_v38  ;;  %v467_v42 = vmax.f32 %v463_v36, %v466_v40 }
  0xfd   :  { %v363_v43 = vmax.f32 %v258_v31, %v362_v41 }
  0xff   :  { %v468_v44 = vmax.f32 %v363_v43, %v467_v42 }
 0x106   :  { %v567_v45 = vpop.f32.mrb[4].mxu0 }
 0x107   :  { %v568_v46 = vadd.f32 %v777_v19, %v567_v45  ;;  %v944_v47 = vpop.f32.mrb[5].mxu0 }
 0x109   :  { %v571_v48 = vmul.f32 0.01, %v568_v46 }
 0x10b   :  { %v572_v49 = vmax.f32 %v568_v46, %v571_v48 }
 0x10d   :  { %v573_v50 = vmax.f32 %v468_v44, %v572_v49 }
 0x10f   :  { %962 = vmatmul.mubr.msk.f32.vlgmr.msra.gmra.mrb[4].mxu1 %vm79_vm8, %v573_v50 }
 0x1e2   :  { %v658_v58 = vpop.f32.mrb[4].mxu1 }
 0x1e3   :  { %v659_v59 = vadd.f32 %v783_v57, %v658_v58  ;;  %v963_v4 = vpop.f32.mrb[5].mxu1 }
 0x1e5   :  { %v662_v60 = vmul.f32 0.01, %v659_v59 }
 0x1e7   :  { %v663_v61 = vmax.f32 %v659_v59, %v662_v60 }
 0x1e9   :  { %981 = vmatmul.mubr.msk.f32.vlgmr.msra.gmra.mrb[6].mxu0 %vm79_vm8, %v663_v61 }
 0x2bc   :  { %v748_v62 = vpop.f32.mrb[6].mxu0 }
 0x2bd   :  { %v749_v63 = vadd.f32 %v785_v3, %v748_v62  ;;  %v982_v10 = vpop.f32.mrb[7].mxu0 }
 0x2bf   :  { %v752_v26 = vmul.f32 0.01, %v749_v63 }
 0x2c1   :  { %v753_v0 = vmax.f32 %v749_v63, %v752_v26 }
 0x2c3   :  { %v754_v1 = vmul.f32 %v753_v0, %v753_v0 }
 0x2c5   :  { %v756_v39 = vsel %vm755_vm9, %v754_v1, 0.0 }
 0x2c6   :  { %757 = vadd.xlane.f32.xlu0 %v756_v39 }
 0x353   :  { %v758_v2 = vpop.xlane.xlu0 %757 }
 0x354   :  { %v759_v5 = vmax.f32 %v758_v2, 1e-24 }
 0x356   :  { %1071 = vrsqrt.f32 %v759_v5 }
 0x360   :  { %v1072_v8 = vpop.eup %1071 }
 0x361   :  { %v761_v6 = vmul.f32 %v1072_v8, %v753_v0 }
 0x363   :  { %762 = vst.msk [vmem:[#allocation2] sm:$0xff] %vm755_vm9, %v761_v6 }
 0x364   :  { %1084 = shalt.err (!%p1081_p4)
}
 0x365   :  { %s1085_s13 = scalar_lea.hbm %s1473_s7, 128 }
 0x366   :  { %p1086_p5 = scmp.ne.s32.totalorder %s1473_s7, %s1085_s13  ;;  %p1089_p6 = scmp.lt.u32.totalorder %s1085_s13, %s1473_s7 }
 0x368   :  { %p1091_p7 = pnand %p1089_p6, %p1086_p5 }
 0x36a   :  { %1094 = shalt.err (!%p1091_p7)
}
 0x36b   :  { %772 = dma.vmem_to_hbm [thread:$0]  %s770_s5, 128, %s1473_s7, [#allocation3]  }
 0x36c   :  { %1095 = dma.done.wait [#allocation3], 128  }
 0x36d   :  { %1096 = vsyncadd [#allocation3], 4294967168 }
 0x36e   :  { %776 = vsyncpa [#allocation3], 1 }

</bundles_post_ra>
